<compile_context>
chip_gen: v7x
topology: tpu7x:2x2x1
jax: 0.10.0
libtpu: 0.0.40
codegen_flags: <defaults>
</compile_context>

<pallas_src>
import math

import jax
import jax.numpy as jnp
from jax import lax
from jax.experimental import pallas as pl
from jax.experimental.pallas import tpu as pltpu

_INV_SQRT2 = 1.0 / math.sqrt(2.0)


def _round_up(x, m):
    return ((x + m - 1) // m) * m


def _cdiv(a, b):
    return (a + b - 1) // b


# --------------------------------------------------------------------------- #
# Kernels
# --------------------------------------------------------------------------- #
def _mlp_kernel_resident(x_ref, w1_ref, b1_ref, w2_ref, b2_ref, o_ref):
    """Weights fully VMEM-resident: one (tm, dim) batch tile, no scratch."""
    h = jnp.dot(x_ref[...], w1_ref[...], preferred_element_type=jnp.float32)
    h = h + b1_ref[...]                                   # (1, H) f32, broadcast rows
    h = 0.5 * h * (1.0 + lax.erf(h * _INV_SQRT2))         # exact erf GELU, f32
    out = jnp.dot(h.astype(w2_ref.dtype), w2_ref[...],
                  preferred_element_type=jnp.float32)
    o_ref[...] = (out + b2_ref[...]).astype(o_ref.dtype)


def _mlp_kernel_chunked(x_ref, w1_ref, b1_ref, w2_ref, b2_ref, o_ref, acc_ref):
    """Hidden dimension split into chunks; grid axis 1 is the reduction."""
    k = pl.program_id(1)

    @pl.when(k == 0)
    def _():
        # Fold the output bias into the accumulator init (saves a VPU pass later).
        acc_ref[...] = jnp.broadcast_to(b2_ref[...], acc_ref.shape)

    # linear1 chunk: (tm, dim) @ (dim, th) -> f32
    h = jnp.dot(x_ref[...], w1_ref[...], preferred_element_type=jnp.float32)
    h = h + b1_ref[...]
    h = 0.5 * h * (1.0 + lax.erf(h * _INV_SQRT2))         # exact erf GELU, f32

    # linear2 partial product, accumulated in f32.
    acc_ref[...] += jnp.dot(h.astype(w2_ref.dtype), w2_ref[...],
                            preferred_element_type=jnp.float32)

    @pl.when(k == pl.num_programs(1) - 1)
    def _():
        o_ref[...] = acc_ref[...].astype(o_ref.dtype)     # bias already folded in


# --------------------------------------------------------------------------- #
# Sizing helpers
# --------------------------------------------------------------------------- #
def _vmem_capacity_bytes():
    """Physical VMEM of the current chip; conservative (v7x per-TC) fallback."""
    try:
        return int(pltpu.get_tpu_info().vmem_capacity_bytes)
    except Exception:
        return 64 * 1024 * 1024


def _vmem_needed(tm, dim, th, n_k, itemsize, out_itemsize):
    """Rough per-step VMEM footprint (double-buffered tiles + scratch)."""
    weights = 2 * 2 * dim * th * itemsize                 # w1/w2 slices, 2-buffered
    xio = 2 * tm * dim * (itemsize + out_itemsize)        # x + out tiles, 2-buffered
    h_tmp = tm * th * 4                                    # f32 GELU intermediate
    acc = tm * dim * 4 if n_k > 1 else 0                   # f32 accumulator scratch
    biases = 8 * (th + dim) * 4                            # padded f32 bias rows
    return weights + xio + h_tmp + acc + biases


def _choose_hidden_chunk(hidden, dim, tm, itemsize, out_itemsize, budget):
    """Largest MXU-friendly divisor of `hidden` whose working set fits `budget`."""
    align = 256 if hidden % 256 == 0 else 128              # 256x256 MXU on v6e/v7x
    if hidden % align != 0:
        # TODO(synk): pad hidden to a lane multiple for odd hidden sizes.
        return hidden
    smallest = align
    for th in range(hidden, align - 1, -align):
        if hidden % th:
            continue
        if _vmem_needed(tm, dim, th, 2, itemsize, out_itemsize) <= budget:
            return th
        smallest = th
    return smallest


def _pick_batch_tile(B, block_b, mult):
    """Batch tile (multiple of `mult`), preferring >=2 balanced tiles (megacore)."""
    tm = _round_up(max(mult, min(block_b, _round_up(B, mult))), mult)
    n_b = _cdiv(B, tm)
    if n_b == 1 and B > mult:
        tm = _round_up(_cdiv(B, 2), mult)                  # split into two tiles
        n_b = _cdiv(B, tm)
    elif n_b > 1 and n_b % 2 == 1:
        tm_try = _round_up(_cdiv(B, n_b + 1), mult)        # try for an even count
        if tm_try >= mult and _cdiv(B, tm_try) % 2 == 0:
            tm, n_b = tm_try, _cdiv(B, tm_try)
    return tm, n_b


# --------------------------------------------------------------------------- #
# Wrapper
# --------------------------------------------------------------------------- #
def mlp_forward(x, w1, b1, w2, b2, *, block_b=512, hidden_chunk=None,
                compute_dtype=jnp.bfloat16, out_dtype=None):
    """x: (B, dim), w1: (dim, hidden), b1: (hidden,), w2: (hidden, dim), b2: (dim,)."""
    B, dim = x.shape
    hidden = w1.shape[1]
    assert w1.shape == (dim, hidden) and w2.shape == (hidden, dim)
    assert dim % 128 == 0, "dim must be lane-dense (multiple of 128)"

    if out_dtype is None:
        out_dtype = x.dtype
    if compute_dtype is not None:
        x = x.astype(compute_dtype)
        w1 = w1.astype(compute_dtype)
        w2 = w2.astype(compute_dtype)

    # Biases stay f32 (added to the f32 accumulator), lane-dense 2-D rows.
    b1_2d = b1.astype(jnp.float32).reshape(1, hidden)
    b2_2d = b2.astype(jnp.float32).reshape(1, dim)

    itemsize = jnp.dtype(x.dtype).itemsize
    out_itemsize = jnp.dtype(out_dtype).itemsize
    mult = max(8, 32 // itemsize)                          # 8 f32 / 16 bf16 / 32 int8

    # ---- generation-aware VMEM budgets ----
    vmem_cap = _vmem_capacity_bytes()
    resident_budget = int(vmem_cap * 0.60)                 # ~76 MiB v5e/v6e, ~38 MiB v7x
    vmem_limit_cap = min(int(vmem_cap * 0.75), vmem_cap - (8 << 20))

    # ---- batch tiling ----
    tm, n_b = _pick_batch_tile(B, block_b, mult)
    B_pad = tm * n_b
    if B_pad != B:
        x = jnp.pad(x, ((0, B_pad - B), (0, 0)))

    # ---- weights resident vs hidden-chunked reduction ----
    if hidden_chunk is not None:
        th = hidden_chunk
        assert hidden % th == 0
    elif _vmem_needed(tm, dim, hidden, 1, itemsize, out_itemsize) <= resident_budget:
        th = hidden
    else:
        th = _choose_hidden_chunk(hidden, dim, tm, itemsize, out_itemsize,
                                  resident_budget)
    n_k = hidden // th if hidden % th == 0 else 1
    if n_k == 1:
        th = hidden

    vmem_needed = _vmem_needed(tm, dim, th, n_k, itemsize, out_itemsize)
    vmem_limit = int(min(max(int(vmem_needed * 1.4), 16 << 20), vmem_limit_cap))

    weight_bytes = (w1.size + w2.size) * itemsize
    weight_streams = 1 if n_k == 1 else n_b                # chunked path re-streams
    cost = pl.CostEstimate(
        flops=4 * B_pad * dim * hidden,                    # two matmuls, 2*M*N*K each
        transcendentals=B_pad * hidden,                    # erf
        bytes_accessed=(x.size * itemsize
                        + weight_streams * weight_bytes
                        + (b1_2d.size + b2_2d.size) * 4
                        + B_pad * dim * out_itemsize),
    )
    out_shape = jax.ShapeDtypeStruct((B_pad, dim), out_dtype)

    if n_k == 1:
        out = pl.pallas_call(
            _mlp_kernel_resident,
            out_shape=out_shape,
            grid_spec=pltpu.PrefetchScalarGridSpec(
                num_scalar_prefetch=0,
                grid=(n_b,),
                in_specs=[
                    pl.BlockSpec((tm, dim), lambda i: (i, 0)),      # x batch tile
                    pl.BlockSpec((dim, hidden), lambda i: (0, 0)),  # w1 (resident)
                    pl.BlockSpec((1, hidden), lambda i: (0, 0)),    # b1 (resident)
                    pl.BlockSpec((hidden, dim), lambda i: (0, 0)),  # w2 (resident)
                    pl.BlockSpec((1, dim), lambda i: (0, 0)),       # b2 (resident)
                ],
                out_specs=pl.BlockSpec((tm, dim), lambda i: (i, 0)),
            ),
            compiler_params=pltpu.CompilerParams(
                dimension_semantics=("parallel",),
                vmem_limit_bytes=vmem_limit,
            ),
            cost_estimate=cost,
        )(x, w1, b1_2d, w2, b2_2d)
    else:
        out = pl.pallas_call(
            _mlp_kernel_chunked,
            out_shape=out_shape,
            grid_spec=pltpu.PrefetchScalarGridSpec(
                num_scalar_prefetch=0,
                grid=(n_b, n_k),                                    # reduction last
                in_specs=[
                    pl.BlockSpec((tm, dim), lambda i, k: (i, 0)),   # x batch tile
                    pl.BlockSpec((dim, th), lambda i, k: (0, k)),   # w1 chunk
                    pl.BlockSpec((1, th), lambda i, k: (0, k)),     # b1 chunk
                    pl.BlockSpec((th, dim), lambda i, k: (k, 0)),   # w2 chunk
                    pl.BlockSpec((1, dim), lambda i, k: (0, 0)),    # b2 (resident)
                ],
                out_specs=pl.BlockSpec((tm, dim), lambda i, k: (i, 0)),
                scratch_shapes=[pltpu.VMEM((tm, dim), jnp.float32)],
            ),
            compiler_params=pltpu.CompilerParams(
                dimension_semantics=("parallel", "arbitrary"),
                vmem_limit_bytes=vmem_limit,
            ),
            cost_estimate=cost,
        )(x, w1, b1_2d, w2, b2_2d)

    return out[:B] if B_pad != B else out


# --------------------------------------------------------------------------- #
# Reference + demo
# --------------------------------------------------------------------------- #
def init_params(key, dim, expansion_ratio=4.0):
    """Deterministic init matching nn.Linear shapes (uniform +/- 1/sqrt(fan_in))."""
    hidden = int(expansion_ratio * dim)
    k1, k2, k3, k4 = jax.random.split(key, 4)
    bound1 = 1.0 / math.sqrt(dim)
    bound2 = 1.0 / math.sqrt(hidden)
    w1 = jax.random.uniform(k1, (dim, hidden), jnp.float32, -bound1, bound1)
    b1 = jax.random.uniform(k2, (hidden,), jnp.float32, -bound1, bound1)
    w2 = jax.random.uniform(k3, (hidden, dim), jnp.float32, -bound2, bound2)
    b2 = jax.random.uniform(k4, (dim,), jnp.float32, -bound2, bound2)
    return w1, b1, w2, b2


def mlp_reference(x, w1, b1, w2, b2):
    h = jnp.dot(x, w1, precision=lax.Precision.HIGHEST) + b1
    h = 0.5 * h * (1.0 + lax.erf(h * _INV_SQRT2))
    return jnp.dot(h, w2, precision=lax.Precision.HIGHEST) + b2


if __name__ == "__main__":
    key = jax.random.PRNGKey(0)
    kx, kp = jax.random.split(key)

    dim = 128                 # lane-dense last dim (multiple of 128)
    B = 512                   # -> 2 batch tiles (both TCs busy on v7x)
    x = jax.random.normal(kx, (B, dim), jnp.float32)
    w1, b1, w2, b2 = init_params(kp, dim, expansion_ratio=4.0)   # hidden = 512

    ref = mlp_reference(x, w1, b1, w2, b2)

    # 1) f32 path, weights fully VMEM-resident (specialized no-scratch kernel).
    out_f32 = jax.block_until_ready(
        mlp_forward(x, w1, b1, w2, b2, compute_dtype=jnp.float32))
    assert out_f32.shape == (B, dim)
    assert jnp.allclose(out_f32, ref, atol=2e-3, rtol=2e-3), "f32 kernel mismatch"

    # 2) Forced hidden-chunk reduction path (256-aligned chunks; exercises the
    #    bias-folded accumulator init / finalize).
    out_chunked = jax.block_until_ready(
        mlp_forward(x, w1, b1, w2, b2, compute_dtype=jnp.float32, hidden_chunk=256))
    assert jnp.allclose(out_chunked, ref, atol=2e-3, rtol=2e-3), "chunked kernel mismatch"

    # 3) Default path: bf16 matmul inputs, f32 accumulation / f32 erf GELU.
    out_bf16 = jax.block_until_ready(
        mlp_forward(x, w1, b1, w2, b2, out_dtype=jnp.float32))
    assert jnp.allclose(out_bf16, ref, atol=1e-1, rtol=1e-1), "bf16 kernel mismatch"

    print("KERNEL_OK")
</pallas_src>

<mosaic_0001>
module attributes {stable_mosaic.version = 11 : i64} {
  func.func @_mlp_kernel_resident(%arg0: i32, %arg1: memref<256x128xf32, #tpu.memory_space<vmem>>, %arg2: memref<128x512xf32, #tpu.memory_space<vmem>>, %arg3: memref<1x512xf32, #tpu.memory_space<vmem>>, %arg4: memref<512x128xf32, #tpu.memory_space<vmem>>, %arg5: memref<1x128xf32, #tpu.memory_space<vmem>>, %arg6: memref<256x128xf32, #tpu.memory_space<vmem>>) attributes {dimension_semantics = [#tpu.dimension_semantics<parallel>], iteration_bounds = array<i64: 2>, scalar_prefetch = 0 : i64, scratch_operands = 0 : i64, tpu.core_type = #tpu.core_type<tc>, window_params = [{transform_indices = @transform_0, window_bounds = array<i64: 256, 128>}, {pipeline_mode = #tpu.pipeline_mode<synchronous>, transform_indices = @transform_1, window_bounds = array<i64: 128, 512>}, {pipeline_mode = #tpu.pipeline_mode<synchronous>, transform_indices = @transform_2, window_bounds = array<i64: 1, 512>}, {pipeline_mode = #tpu.pipeline_mode<synchronous>, transform_indices = @transform_3, window_bounds = array<i64: 512, 128>}, {pipeline_mode = #tpu.pipeline_mode<synchronous>, transform_indices = @transform_4, window_bounds = array<i64: 1, 128>}, {transform_indices = @transform_5, window_bounds = array<i64: 256, 128>}]} {
    %c0 = arith.constant 0 : index
    %c0_0 = arith.constant 0 : index
    %0 = vector.load %arg1[%c0, %c0_0] : memref<256x128xf32, #tpu.memory_space<vmem>>, vector<256x128xf32>
    %c0_1 = arith.constant 0 : index
    %c0_2 = arith.constant 0 : index
    %1 = vector.load %arg2[%c0_1, %c0_2] : memref<128x512xf32, #tpu.memory_space<vmem>>, vector<128x512xf32>
    %cst = arith.constant dense<0.000000e+00> : vector<256x512xf32>
    %2 = tpu.matmul %0, %1, %cst {dimension_numbers = #tpu.dot_dimension_numbers<[1], [0], [0], [1], [0, 0, 1, 1], [], []>} : vector<256x128xf32>, vector<128x512xf32>, vector<256x512xf32> -> vector<256x512xf32>
    %c0_3 = arith.constant 0 : index
    %c0_4 = arith.constant 0 : index
    %3 = vector.load %arg3[%c0_3, %c0_4] : memref<1x512xf32, #tpu.memory_space<vmem>>, vector<1x512xf32>
    %4 = vector.broadcast %3 : vector<1x512xf32> to vector<256x512xf32>
    %5 = arith.addf %2, %4 : vector<256x512xf32>
    %cst_5 = arith.constant 5.000000e-01 : f32
    %6 = vector.broadcast %cst_5 : f32 to vector<256x512xf32>
    %7 = arith.mulf %6, %5 : vector<256x512xf32>
    %cst_6 = arith.constant 0.707106769 : f32
    %8 = vector.broadcast %cst_6 : f32 to vector<256x512xf32>
    %9 = arith.mulf %5, %8 : vector<256x512xf32>
    %10 = math.erf %9 : vector<256x512xf32>
    %cst_7 = arith.constant 1.000000e+00 : f32
    %11 = vector.broadcast %cst_7 : f32 to vector<256x512xf32>
    %12 = arith.addf %11, %10 : vector<256x512xf32>
    %13 = arith.mulf %7, %12 : vector<256x512xf32>
    %c0_8 = arith.constant 0 : index
    %c0_9 = arith.constant 0 : index
    %14 = vector.load %arg4[%c0_8, %c0_9] : memref<512x128xf32, #tpu.memory_space<vmem>>, vector<512x128xf32>
    %cst_10 = arith.constant dense<0.000000e+00> : vector<256x128xf32>
    %15 = tpu.matmul %13, %14, %cst_10 {dimension_numbers = #tpu.dot_dimension_numbers<[1], [0], [0], [1], [0, 0, 1, 1], [], []>} : vector<256x512xf32>, vector<512x128xf32>, vector<256x128xf32> -> vector<256x128xf32>
    %c0_11 = arith.constant 0 : index
    %c0_12 = arith.constant 0 : index
    %16 = vector.load %arg5[%c0_11, %c0_12] : memref<1x128xf32, #tpu.memory_space<vmem>>, vector<1x128xf32>
    %17 = vector.broadcast %16 : vector<1x128xf32> to vector<256x128xf32>
    %18 = arith.addf %15, %17 : vector<256x128xf32>
    %c0_13 = arith.constant 0 : index
    %c0_14 = arith.constant 0 : index
    %19 = vector.load %arg6[%c0_13, %c0_14] : memref<256x128xf32, #tpu.memory_space<vmem>>, vector<256x128xf32>
    tpu.vector_store %arg6[%c0_13, %c0_14], %18 {strides = array<i32>} : memref<256x128xf32, #tpu.memory_space<vmem>>, vector<256x128xf32>,
    return
  }
  func.func @transform_0(%arg0: i32) -> (i32, i32) {
    %c0_i32 = arith.constant 0 : i32
    %c0_i32_0 = arith.constant 0 : i32
    return %arg0, %c0_i32 : i32, i32
  }
  func.func @transform_1(%arg0: i32) -> (i32, i32) {
    %c0_i32 = arith.constant 0 : i32
    %c0_i32_0 = arith.constant 0 : i32
    %c0_i32_1 = arith.constant 0 : i32
    return %c0_i32, %c0_i32_0 : i32, i32
  }
  func.func @transform_2(%arg0: i32) -> (i32, i32) {
    %c0_i32 = arith.constant 0 : i32
    %c0_i32_0 = arith.constant 0 : i32
    %c0_i32_1 = arith.constant 0 : i32
    return %c0_i32, %c0_i32_0 : i32, i32
  }
  func.func @transform_3(%arg0: i32) -> (i32, i32) {
    %c0_i32 = arith.constant 0 : i32
    %c0_i32_0 = arith.constant 0 : i32
    %c0_i32_1 = arith.constant 0 : i32
    return %c0_i32, %c0_i32_0 : i32, i32
  }
  func.func @transform_4(%arg0: i32) -> (i32, i32) {
    %c0_i32 = arith.constant 0 : i32
    %c0_i32_0 = arith.constant 0 : i32
    %c0_i32_1 = arith.constant 0 : i32
    return %c0_i32, %c0_i32_0 : i32, i32
  }
  func.func @transform_5(%arg0: i32) -> (i32, i32) {
    %c0_i32 = arith.constant 0 : i32
    %c0_i32_0 = arith.constant 0 : i32
    return %arg0, %c0_i32 : i32, i32
  }
}

</mosaic_0001>

<bundles_post_ra>
// kernel: tpu_custom_call.1
= control target key start
LH: loop header
LB: loop body
LE: loop exit
PB: predicated region body
PF: predicated region fallthrough
CT: control target
= control target key end

     0   :  { %10 = vsyncpa [#allocation3], 0  ;;  %s4382_s0 = inlined_call_operand.hbm [shape: f32[512,128], index: 0, kind: input, shape index: {}]   ;;  %s4383_s1 = inlined_call_operand.hbm [shape: f32[128,512], index: 1, kind: input, shape index: {}]   ;;  %s4384_s2 = inlined_call_operand.vmem [shape: f32[1,512], index: 2, kind: input, shape index: {}]   ;;  %s4385_s3 = inlined_call_operand.hbm [shape: f32[512,128], index: 3, kind: input, shape index: {}]   ;;  %s4386_s4 = inlined_call_operand.vmem [shape: f32[1,128], index: 4, kind: input, shape index: {}]   ;;  %s4387_s5 = inlined_call_operand.hbm [shape: f32[512,128], index: 5, kind: output, shape index: {}]  }
   0x1   :  { %12 = vsyncpa [#allocation3 + $0x1], 0 }
   0x2   :  { %13 = vsyncpa [#allocation6], 0 }
   0x3   :  { %14 = vsyncpa [#allocation4], 0 }
   0x4   :  { %16 = vsyncpa [#allocation4 + $0x1], 0  ;;  %s2981_s18 = smov 0   ;;  %s2983_s19 = smov 0  }
   0x5   :  { %s2985_s20 = smov 0   ;;  %s2987_s21 = smov 0  }
   0x6 LB: > { %s3002_s22 = sadd.s32 4294967295, %s2937_s21   ;;  %s2205_s23 = sadd.s32 4294967294, %s2937_s21   ;;  %s2937_s21 = sphi %s2987_s21, %s4481_s21   ;;  %s2933_s20 = sphi %s2985_s20, %s4480_s20   ;;  %s2929_s19 = sphi %s2983_s19, %s4479_s19   ;;  %s2925_s18 = sphi %s2981_s18, %s4478_s18  }
   0x7   : > { %p42_p0 = scmp.ne.s32.totalorder %s2929_s19, %s2925_s18  ;;  %p4388_p1 = scmp.eq.s32.totalorder %s3002_s22, 0 }
   0x8   : > { %p156_p3 = scmp.eq.s32.totalorder %s2205_s23, 1  ;;  %p2206_p5 = scmp.ge.s32.totalorder %s2937_s21, 1 }
   0x9   : > { %p3011_p4 = por %p4388_p1, %p42_p0  ;;  %p163_p7 = scmp.lt.s32.totalorder %s2937_s21, 3 }
   0xa   : > { %p3016_p6 = por %p156_p3, %p42_p0  ;;  %s2939_s27 = smov [#allocation5]  }
   0xb   : > { %s4391_s24 = scalar_select %p3011_p4, 1, 0 }
   0xc   : > { %s4392_s25 = scalar_select %p3016_p6, 1, 0 }
   0xd   : > { %p3021_p8 = pnand %p2206_p5, %p163_p7  ;;  %s175_s28 = sshll.u32 %s2939_s27, 4  ;;  %s3025_s28 = int_to_ptr.vmem [resolvable:$true] %s175_s28 }
   0xe   : > { %s2940_s30 = smov [#allocation7]   ;;  %s2781_s9 = scalar_lea.hbm %s4383_s1, 8192 }
   0xf   : > { %p2462_p9 = pneg %p3021_p8  ;;  %s191_s6 = sshll.u32 %s2940_s30, 4  ;;  %s3036_s6 = int_to_ptr.vmem [resolvable:$true] %s191_s6 }
  0x10   : > { %p2782_p12 = scmp.ne.s32.totalorder %s4383_s1, %s2781_s9  ;;  %p2788_p5 = scmp.lt.u32.totalorder %s2781_s9, %s4383_s1 }
  0x11   : > { %p3032_p11 = pnand %p2462_p9, %p4388_p1 }
  0x13   : > { %p2783_p13 = pneg %p3032_p11 }
  0x15   : > { %p2784_p0 = pnand %p2783_p13, %p2782_p12 }
  0x17   : > { %p2785_p3 = pneg %p2784_p0 }
  0x19   : > { %p2790_p7 = pnand %p2788_p5, %p2785_p3 }
  0x1b   : > { %2793 = shalt.err (!%p2790_p7)
}
  0x1c   : > { %s2794_s14 = scalar_lea.vmem %s3025_s28, 8192  ;;  %p2802_p2 = scmp.lt.s32.totalorder %s3025_s28, %s3025_s28 }
  0x1d   : > { %p2795_p9 = scmp.ne.s32.totalorder %s3025_s28, %s2794_s14  ;;  %p2803_p12 = scmp.lt.s32.totalorder %s2794_s14, %s2794_s14 }
  0x1f   : > { %p2797_p10 = pnand %p2795_p9, %p2783_p13  ;;  %p2804_p0 = por %p2803_p12, %p2802_p2 }
  0x21   : > { %p2798_p1 = pneg %p2797_p10 }
  0x23   : > { %p2805_p6 = pnand %p2804_p0, %p2798_p1 }
  0x25   : > { %2808 = shalt.err (!%p2805_p6)
}
  0x26   : > { %s2941_s15 = smov 512   ;;  %s2942_s16 = smov 32  }
  0x27   : > { %2465 = dma.hbm_to_vmem [thread:$0]  (!%p3032_p11), %s4383_s1, 8192, %s3025_s28, [#allocation6], %s2941_s15, %s2941_s15, %s2942_s16  }
  0x28   : > { %s2809_s7 = scalar_lea.hbm %s4385_s3, 8192 }
  0x29   : > { %p2810_p2 = scmp.ne.s32.totalorder %s4385_s3, %s2809_s7  ;;  %p2816_p10 = scmp.lt.u32.totalorder %s2809_s7, %s4385_s3 }
  0x2b   : > { %p2812_p1 = pnand %p2810_p2, %p2783_p13 }
  0x2d   : > { %p2813_p6 = pneg %p2812_p1 }
  0x2f   : > { %p2818_p3 = pnand %p2816_p10, %p2813_p6 }
  0x31   : > { %2821 = shalt.err (!%p2818_p3)
}
  0x32   : > { %s2822_s28 = scalar_lea.vmem %s3036_s6, 8192  ;;  %p2830_p12 = scmp.lt.s32.totalorder %s3036_s6, %s3036_s6 }
  0x33   : > { %p2823_p5 = scmp.ne.s32.totalorder %s3036_s6, %s2822_s28  ;;  %p2831_p0 = scmp.lt.s32.totalorder %s2822_s28, %s2822_s28 }
  0x35   : > { %p2825_p7 = pnand %p2823_p5, %p2783_p13  ;;  %p2832_p2 = por %p2831_p0, %p2830_p12 }
  0x37   : > { %p2826_p9 = pneg %p2825_p7 }
  0x39   : > { %p2833_p1 = pnand %p2832_p2, %p2826_p9 }
  0x3b   : > { %2836 = shalt.err (!%p2833_p1)
}
  0x3c   : > { %s2943_s12 = smov 128   ;;  %s2944_s13 = smov 8  }
  0x3d   : > { %2468 = dma.hbm_to_vmem [thread:$0]  (!%p3032_p11), %s4385_s3, 8192, %s3036_s6, [#allocation6], %s2943_s12, %s2943_s12, %s2944_s13  }
  0x3e   : > { %s3094_s16 = sadd.s32 1, %s2937_s21   ;;  %s29_s23 = sadd.s32 1, %s2933_s20 }
  0x3f   : > { %s26_s17 = ssub.s32 %s2937_s21, %s3094_s16  ;;  %p36_p6 = scmp.ne.s32.totalorder %s2933_s20, %s2929_s19 }
  0x40   : > { %p27_p13 = scmp.eq.s32.totalorder %s26_s17, 0  ;;  %p37_p10 = scmp.eq.s32.totalorder %s2937_s21, 0 }
  0x41   : > { %p4395_p5 = scmp.eq.s32.totalorder %s3002_s22, 1  ;;  %p2479_p9 = scmp.lt.s32.totalorder %s2937_s21, 2 }
  0x42   : > { %s3103_s27 = scalar_select %p27_p13, %s2933_s20, %s29_s23  }
  0x43   : > { %p38_p3 = por %p37_p10, %p36_p6  ;;  %p3107_p7 = por %p4395_p5, %p36_p6 }
  0x44   : > { %s208_s30 = sand.u32 1, %s2933_s20   ;;  %s2224_s6 = sshll.u32 %s2937_s21, 12 }
  0x45   : > { %s4396_s29 = scalar_select %p3107_p7, 1, 0 }
  0x46   : > { %s2210_s7 = sshll.u32 %s208_s30, 8  ;;  %s3117_s10 = scalar_lea.hbm %s4382_s0, %s2224_s6 }
  0x47   : > { %s212_s11 = scalar_lea.vmem [#allocation2], %s2210_s7  ;;  %p3121_p11 = pnand %p2479_p9, %p38_p3 }
  0x48   : > { %s219_s28 = sshll.u32 %s212_s11, 4  ;;  %s3125_s15 = scalar_lea.sflag [#allocation3], %s208_s30  ;;  %s3119_s28 = int_to_ptr.vmem [resolvable:$true] %s219_s28 }
  0x49   : > { %s2837_s17 = scalar_lea.hbm %s3117_s10, 4096  ;;  %p2839_p0 = pneg %p3121_p11 }
  0x4a   : > { %p2838_p12 = scmp.ne.s32.totalorder %s3117_s10, %s2837_s17  ;;  %s2842_s6 = scalar_lea.hbm %s4382_s0, 8192 }
  0x4b   : > { %p2843_p13 = scmp.lt.u32.totalorder %s3117_s10, %s4382_s0  ;;  %p2844_p6 = scmp.lt.u32.totalorder %s2842_s6, %s2837_s17 }
  0x4c   : > { %p2840_p2 = pnand %p2839_p0, %p2838_p12  ;;  %p2846_p3 = scmp.lt.u32.totalorder %s2837_s17, %s3117_s10 }
  0x4d   : > { %p2845_p10 = por %p2844_p6, %p2843_p13 }
  0x4e   : > { %p2841_p1 = pneg %p2840_p2 }
  0x4f   : > { %p2847_p5 = por %p2846_p3, %p2845_p10 }
  0x51   : > { %p2848_p9 = pnand %p2847_p5, %p2841_p1 }
  0x53   : > { %2851 = shalt.err (!%p2848_p9)
}
  0x54   : > { %s2852_s30 = scalar_lea.vmem %s3119_s28, 4096  ;;  %s2945_s11 = smov [#allocation2]  }
  0x55   : > { %p2853_p12 = scmp.ne.s32.totalorder %s3119_s28, %s2852_s30  ;;  %s2857_s23 = sshll.u32 %s2945_s11, 4  ;;  %s2858_s23 = int_to_ptr.vmem [resolvable:$false] %s2857_s23 }
  0x56   : > { %s2859_s7 = scalar_lea.vmem %s2858_s23, 8192  ;;  %p2860_p4 = scmp.lt.s32.totalorder %s3119_s28, %s2858_s23 }
  0x57   : > { %p2855_p2 = pnand %p2853_p12, %p2839_p0  ;;  %p2861_p13 = scmp.lt.s32.totalorder %s2859_s7, %s2852_s30 }
  0x59   : > { %p2856_p7 = pneg %p2855_p2  ;;  %p2862_p6 = por %p2861_p13, %p2860_p4 }
  0x5b   : > { %p2863_p10 = pnand %p2862_p6, %p2856_p7 }
  0x5d   : > { %2866 = shalt.err (!%p2863_p10)
}
  0x5e   : > { %2472 = dma.hbm_to_vmem [thread:$0]  (!%p3121_p11), %s3117_s10, 4096, %s3119_s28, %s3125_s15, %s2943_s12, %s2943_s12, %s2944_s13  }
  0x5f   : > { %231 = sbr.rel (%p3021_p8) target bundleno = 791 (0x317), region = 40 }
  0x66   : > { %s3159_s17 = sand.u32 1, %s2929_s19   ;;  %p4398_p4 = scmp.ne.s32.totalorder %s4391_s24, 0 }
  0x67   : > { %s2214_s6 = sshll.u32 %s3159_s17, 8  ;;  %s234_s8 = scalar_lea.sflag [#allocation3], %s3159_s17 }
  0x68   : > { %s3165_s14 = scalar_lea.vmem [#allocation2], %s2214_s6 }
  0x69   : > { %2912 = dma.done.wait (%p4398_p4), %s234_s8, 4096  }
  0x6a   : > { %2914 = vsyncadd (%p4398_p4), %s234_s8, 4294963200  ;;  %p4399_p7 = scmp.eq.s32.totalorder %s3002_s22, 0 }
  0x6c   : > { %2916 = dma.done.wait (%p4399_p7), [#allocation6], 16384   ;;  %p4400_p8 = pmov %p4399_p7 }
  0x6d   : > { %v2946_v0 = vmov 0.0   ;;  %v307_v1 = vld [vmem:[#allocation5 + $0x8] sm:$0xff]  ;;  %v309_v3 = vld [vmem:[#allocation5 + $0x18] sm:$0xff]  ;;  %v306_v6 = vld [vmem:[#allocation5] sm:$0xff]  ;;  %s4266_s10 = scalar_lea.vmem [#allocation8], %s2214_s6  ;;  %s2225_s28 = sshll.u32 %s3002_s22, 12 }
  0x6e   : > { %2918 = vsyncadd (%p4400_p8), [#allocation6], 4294950912  ;;  %456 = vmatprep.mubr.f32.mxu0 %v2946_v0  ;;  %713 = vmatprep.mubr.f32.mxu1 %v2946_v0  ;;  %v311_v2 = vld [vmem:[#allocation5 + $0x28] sm:$0xff]  ;;  %v313_v5 = vld [vmem:[#allocation5 + $0x38] sm:$0xff]  ;;  %s2113_s15 = sshll.u32 %s4266_s10, 4  ;;  %s4335_s11 = scalar_lea.hbm %s4387_s5, %s2225_s28  ;;  %s4337_s15 = int_to_ptr.vmem [resolvable:$true] %s2113_s15 }
  0x6f   : > { %v2226_v4 = vpack.c.bf16 %v311_v2, %v307_v1  ;;  %v310_v7 = vld [vmem:[#allocation5 + $0x20] sm:$0xff]  ;;  %v2258_v8 = vpack.c.bf16 %v313_v5, %v309_v3  ;;  %v308_v10 = vld [vmem:[#allocation5 + $0x10] sm:$0xff]  ;;  %v315_v12 = vld [vmem:[#allocation5 + $0x48] sm:$0xff]  ;;  %s2100_s22 = scalar_lea.sflag [#allocation4], %s3159_s17  ;;  %s2867_s23 = scalar_lea.vmem %s4337_s15, 4096 }
  0x70   : > { %v2228_v9 = vpack.c.bf16 %v310_v7, %v306_v6  ;;  %v312_v11 = vld [vmem:[#allocation5 + $0x30] sm:$0xff]  ;;  %v319_v14 = vld [vmem:[#allocation5 + $0x68] sm:$0xff]  ;;  %v317_v15 = vld [vmem:[#allocation5 + $0x58] sm:$0xff]  ;;  %p2868_p11 = scmp.ne.s32.totalorder %s4337_s15, %s2867_s23  ;;  %p4475_p0 = scmp.ne.s32.totalorder %s4396_s29, 0 }
  0x71   : > { %2227 = vmatprep.subr.bf16.mxu0 %v2226_v4  ;;  %v2260_v13 = vpack.c.bf16 %v312_v11, %v308_v10  ;;  %v321_v16 = vld [vmem:[#allocation5 + $0x78] sm:$0xff]  ;;  %2259 = vmatprep.subr.bf16.mxu1 %v2258_v8  ;;  %v2230_v17 = vpack.c.bf16 %v319_v14, %v315_v12  ;;  %v314_v19 = vld [vmem:[#allocation5 + $0x40] sm:$0xff]  ;;  %v316_v21 = vld [vmem:[#allocation5 + $0x50] sm:$0xff]  ;;  %s2948_s7 = smov [#allocation8]  }
  0x72   : > { %2229 = vmatpush1.bf16.msra.mxu0 %v2228_v9  ;;  %v2262_v18 = vpack.c.bf16 %v321_v16, %v317_v15  ;;  %v318_v20 = vld [vmem:[#allocation5 + $0x60] sm:$0xff]  ;;  %v320_v23 = vld [vmem:[#allocation5 + $0x70] sm:$0xff]  ;;  %v323_v24 = vld [vmem:[#allocation5 + $0x88] sm:$0xff]  ;;  %p2869_p1 = pnand %p2868_p11, %p4475_p0  ;;  %s2871_s6 = sshll.u32 %s2948_s7, 4  ;;  %s2872_s6 = int_to_ptr.vmem [resolvable:$false] %s2871_s6 }
  0x73   : > { %2261 = vmatpush1.bf16.msra.mxu1 %v2260_v13  ;;  %v2232_v22 = vpack.c.bf16 %v318_v20, %v314_v19  ;;  %v327_v25 = vld [vmem:[#allocation5 + $0xa8] sm:$0xff]  ;;  %2231 = vmatprep.subr.bf16.mxu0 %v2230_v17  ;;  %v2264_v26 = vpack.c.bf16 %v320_v23, %v316_v21  ;;  %v325_v28 = vld [vmem:[#allocation5 + $0x98] sm:$0xff]  ;;  %v322_v30 = vld [vmem:[#allocation5 + $0x80] sm:$0xff]  ;;  %s2873_s8 = scalar_lea.vmem %s2872_s6, 8192  ;;  %p2874_p5 = scmp.lt.s32.totalorder %s4337_s15, %s2872_s6 }
  0x74   : > { %2263 = vmatprep.subr.bf16.mxu1 %v2262_v18  ;;  %v2234_v27 = vpack.c.bf16 %v327_v25, %v323_v24  ;;  %v329_v29 = vld [vmem:[#allocation5 + $0xb8] sm:$0xff]  ;;  %v326_v32 = vld [vmem:[#allocation5 + $0xa0] sm:$0xff]  ;;  %v324_v33 = vld [vmem:[#allocation5 + $0x90] sm:$0xff]  ;;  %p2870_p3 = pneg %p2869_p1  ;;  %p2875_p9 = scmp.lt.s32.totalorder %s2873_s8, %s2867_s23 }
  0x75   : > { %v2266_v31 = vpack.c.bf16 %v329_v29, %v325_v28  ;;  %v328_v34 = vld [vmem:[#allocation5 + $0xb0] sm:$0xff]  ;;  %v2236_v35 = vpack.c.bf16 %v326_v32, %v322_v30  ;;  %v331_v36 = vld [vmem:[#allocation5 + $0xc8] sm:$0xff]  ;;  %v333_v38 = vld [vmem:[#allocation5 + $0xd8] sm:$0xff] }
  0x76   : > { %2233 = vmatpush1.bf16.msra.mxu0 %v2232_v22  ;;  %v335_v37 = vld [vmem:[#allocation5 + $0xe8] sm:$0xff]  ;;  %v2268_v39 = vpack.c.bf16 %v328_v34, %v324_v33  ;;  %v337_v41 = vld [vmem:[#allocation5 + $0xf8] sm:$0xff]  ;;  %v330_v42 = vld [vmem:[#allocation5 + $0xc0] sm:$0xff]  ;;  %p2876_p12 = por %p2875_p9, %p2874_p5 }
  0x77   : > { %2265 = vmatpush1.bf16.msra.mxu1 %v2264_v26  ;;  %2235 = vmatprep.subr.bf16.mxu0 %v2234_v27  ;;  %v2238_v40 = vpack.c.bf16 %v335_v37, %v331_v36  ;;  %v334_v43 = vld [vmem:[#allocation5 + $0xe0] sm:$0xff]  ;;  %v2270_v44 = vpack.c.bf16 %v337_v41, %v333_v38  ;;  %v332_v45 = vld [vmem:[#allocation5 + $0xd0] sm:$0xff]  ;;  %v339_v47 = vld [vmem:[#allocation5 + $0x108] sm:$0xff] }
  0x78   : > { %2267 = vmatprep.subr.bf16.mxu1 %v2266_v31  ;;  %v336_v46 = vld [vmem:[#allocation5 + $0xf0] sm:$0xff]  ;;  %v343_v48 = vld [vmem:[#allocation5 + $0x128] sm:$0xff]  ;;  %v341_v49 = vld [vmem:[#allocation5 + $0x118] sm:$0xff]  ;;  %v2240_v51 = vpack.c.bf16 %v334_v43, %v330_v42  ;;  %p2877_p2 = pnand %p2876_p12, %p2870_p3 }
  0x79   : > { %v345_v50 = vld [vmem:[#allocation5 + $0x138] sm:$0xff]  ;;  %v2272_v52 = vpack.c.bf16 %v336_v46, %v332_v45  ;;  %v2242_v53 = vpack.c.bf16 %v343_v48, %v339_v47  ;;  %v338_v54 = vld [vmem:[#allocation5 + $0x100] sm:$0xff]  ;;  %v340_v56 = vld [vmem:[#allocation5 + $0x110] sm:$0xff] }
  0x7a   : > { %2237 = vmatpush1.bf16.msra.mxu0 %v2236_v35  ;;  %v342_v55 = vld [vmem:[#allocation5 + $0x120] sm:$0xff]  ;;  %v2274_v57 = vpack.c.bf16 %v345_v50, %v341_v49  ;;  %v344_v58 = vld [vmem:[#allocation5 + $0x130] sm:$0xff]  ;;  %v347_v59 = vld [vmem:[#allocation5 + $0x148] sm:$0xff] }
  0x7b   : > { %2269 = vmatpush1.bf16.msra.mxu1 %v2268_v39  ;;  %2239 = vmatprep.subr.bf16.mxu0 %v2238_v40  ;;  %v351_v60 = vld [vmem:[#allocation5 + $0x168] sm:$0xff]  ;;  %v349_v61 = vld [vmem:[#allocation5 + $0x158] sm:$0xff]  ;;  %v2244_v63 = vpack.c.bf16 %v342_v55, %v338_v54  ;;  %v2276_v1 = vpack.c.bf16 %v344_v58, %v340_v56  ;;  %v346_v3 = vld [vmem:[#allocation5 + $0x140] sm:$0xff]  ;;  %v2947_v40 = vmov 0.0|0.0  }
  0x7c   : > { %2271 = vmatprep.subr.bf16.mxu1 %v2270_v44  ;;  %v353_v62 = vld [vmem:[#allocation5 + $0x178] sm:$0xff]  ;;  %v2246_v2 = vpack.c.bf16 %v351_v60, %v347_v59  ;;  %v350_v4 = vld [vmem:[#allocation5 + $0x160] sm:$0xff]  ;;  %v348_v5 = vld [vmem:[#allocation5 + $0x150] sm:$0xff] }
  0x7d   : > { %v2278_v6 = vpack.c.bf16 %v353_v62, %v349_v61  ;;  %v352_v7 = vld [vmem:[#allocation5 + $0x170] sm:$0xff]  ;;  %v355_v8 = vld [vmem:[#allocation5 + $0x188] sm:$0xff]  ;;  %v357_v10 = vld [vmem:[#allocation5 + $0x198] sm:$0xff]  ;;  %v2248_v12 = vpack.c.bf16 %v350_v4, %v346_v3 }
  0x7e   : > { %2241 = vmatpush1.bf16.msra.mxu0 %v2240_v51  ;;  %v359_v9 = vld [vmem:[#allocation5 + $0x1a8] sm:$0xff]  ;;  %v361_v11 = vld [vmem:[#allocation5 + $0x1b8] sm:$0xff]  ;;  %v2280_v13 = vpack.c.bf16 %v352_v7, %v348_v5  ;;  %v354_v15 = vld [vmem:[#allocation5 + $0x180] sm:$0xff] }
  0x7f   : > { %2273 = vmatpush1.bf16.msra.mxu1 %v2272_v52  ;;  %2243 = vmatprep.subr.bf16.mxu0 %v2242_v53  ;;  %v2250_v14 = vpack.c.bf16 %v359_v9, %v355_v8  ;;  %v358_v16 = vld [vmem:[#allocation5 + $0x1a0] sm:$0xff]  ;;  %v356_v17 = vld [vmem:[#allocation5 + $0x190] sm:$0xff]  ;;  %v2282_v18 = vpack.c.bf16 %v361_v11, %v357_v10  ;;  %v363_v20 = vld [vmem:[#allocation5 + $0x1c8] sm:$0xff] }
  0x80   : > { %2275 = vmatprep.subr.bf16.mxu1 %v2274_v57  ;;  %v360_v19 = vld [vmem:[#allocation5 + $0x1b0] sm:$0xff]  ;;  %v367_v21 = vld [vmem:[#allocation5 + $0x1e8] sm:$0xff]  ;;  %v365_v22 = vld [vmem:[#allocation5 + $0x1d8] sm:$0xff]  ;;  %v2252_v24 = vpack.c.bf16 %v358_v16, %v354_v15 }
  0x81   : > { %v369_v23 = vld [vmem:[#allocation5 + $0x1f8] sm:$0xff]  ;;  %v2284_v25 = vpack.c.bf16 %v360_v19, %v356_v17  ;;  %v2254_v26 = vpack.c.bf16 %v367_v21, %v363_v20  ;;  %v362_v27 = vld [vmem:[#allocation5 + $0x1c0] sm:$0xff]  ;;  %v364_v30 = vld [vmem:[#allocation5 + $0x1d0] sm:$0xff] }
  0x82   : > { %2245 = vmatpush1.bf16.msra.mxu0 %v2244_v63  ;;  %v366_v28 = vld [vmem:[#allocation5 + $0x1e0] sm:$0xff]  ;;  %v2286_v29 = vpack.c.bf16 %v369_v23, %v365_v22  ;;  %v368_v31 = vld [vmem:[#allocation5 + $0x1f0] sm:$0xff]  ;;  %v1547_v35 = vld [vmem:[#allocation7 + $0x8] sm:$0xff] }
  0x83   : > { %2277 = vmatpush1.bf16.msra.mxu1 %v2276_v1  ;;  %2247 = vmatprep.subr.bf16.mxu0 %v2246_v2  ;;  %v2256_v32 = vpack.c.bf16 %v366_v28, %v362_v27  ;;  %v2288_v33 = vpack.c.bf16 %v368_v31, %v364_v30  ;;  %v1546_v34 = vld [vmem:[#allocation7] sm:$0xff]  ;;  %v1579_v37 = vld [vmem:[#allocation7 + $0x108] sm:$0xff]  ;;  %v1548_v42 = vld [vmem:[#allocation7 + $0x10] sm:$0xff] }
  0x84   : > { %2279 = vmatprep.subr.bf16.mxu1 %v2278_v6  ;;  %v1578_v36 = vld [vmem:[#allocation7 + $0x100] sm:$0xff]  ;;  %v2291_v39 = vpack.c.bf16 %v1547_v35, %v1546_v34  ;;  %v1549_v43 = vld [vmem:[#allocation7 + $0x18] sm:$0xff]  ;;  %v1580_v44 = vld [vmem:[#allocation7 + $0x110] sm:$0xff] }
  0x85   : > { %v274_v38 = vld [vmem:[%s3165_s14] sm:$0xff]  ;;  %v2339_v41 = vpack.c.bf16 %v1579_v37, %v1578_v36  ;;  %v1581_v45 = vld [vmem:[#allocation7 + $0x118] sm:$0xff]  ;;  %v275_v46 = vld [vmem:[%s3165_s14 + $0x8] sm:$0xff]  ;;  %v2294_v47 = vpack.c.bf16 %v1549_v43, %v1548_v42 }
  0x86   : > { %2249 = vmatpush1.bf16.msra.mxu0 %v2248_v12  ;;  %v2342_v48 = vpack.c.bf16 %v1581_v45, %v1580_v44  ;;  %v1550_v49 = vld [vmem:[#allocation7 + $0x20] sm:$0xff]  ;;  %v1551_v50 = vld [vmem:[#allocation7 + $0x28] sm:$0xff]  ;;  %v276_v53 = vld [vmem:[%s3165_s14 + $0x10] sm:$0xff] }
  0x87   : > { %2281 = vmatpush1.bf16.msra.mxu1 %v2280_v13  ;;  %2251 = vmatprep.subr.bf16.mxu0 %v2250_v14  ;;  %v1582_v51 = vld [vmem:[#allocation7 + $0x120] sm:$0xff]  ;;  %v1583_v52 = vld [vmem:[#allocation7 + $0x128] sm:$0xff]  ;;  %v2297_v54 = vpack.c.bf16 %v1551_v50, %v1550_v49  ;;  %v1552_v56 = vld [vmem:[#allocation7 + $0x30] sm:$0xff] }
  0x88   : > { %2283 = vmatprep.subr.bf16.mxu1 %v2282_v18  ;;  %v2345_v55 = vpack.c.bf16 %v1583_v52, %v1582_v51  ;;  %v1553_v57 = vld [vmem:[#allocation7 + $0x38] sm:$0xff]  ;;  %v1584_v58 = vld [vmem:[#allocation7 + $0x130] sm:$0xff]  ;;  %v1554_v63 = vld [vmem:[#allocation7 + $0x40] sm:$0xff] }
  0x89   : > { %v1585_v59 = vld [vmem:[#allocation7 + $0x138] sm:$0xff]  ;;  %v2300_v61 = vpack.c.bf16 %v1553_v57, %v1552_v56  ;;  %v1555_v1 = vld [vmem:[#allocation7 + $0x48] sm:$0xff]  ;;  %v1586_v2 = vld [vmem:[#allocation7 + $0x140] sm:$0xff] }
  0x8a   : > { %2253 = vmatpush1.bf16.msra.mxu0 %v2252_v24  ;;  %v277_v60 = vld [vmem:[%s3165_s14 + $0x18] sm:$0xff]  ;;  %v2348_v62 = vpack.c.bf16 %v1585_v59, %v1584_v58  ;;  %v1587_v3 = vld [vmem:[#allocation7 + $0x148] sm:$0xff]  ;;  %v278_v4 = vld [vmem:[%s3165_s14 + $0x20] sm:$0xff]  ;;  %v2303_v5 = vpack.c.bf16 %v1555_v1, %v1554_v63 }
  0x8b   : > { %2285 = vmatpush1.bf16.msra.mxu1 %v2284_v25  ;;  %2255 = vmatprep.subr.bf16.mxu0 %v2254_v26  ;;  %v2351_v6 = vpack.c.bf16 %v1587_v3, %v1586_v2  ;;  %v1556_v7 = vld [vmem:[#allocation7 + $0x50] sm:$0xff]  ;;  %v1557_v8 = vld [vmem:[#allocation7 + $0x58] sm:$0xff]  ;;  %v279_v11 = vld [vmem:[%s3165_s14 + $0x28] sm:$0xff] }
  0x8c   : > { %2287 = vmatprep.subr.bf16.mxu1 %v2286_v29  ;;  %v1588_v9 = vld [vmem:[#allocation7 + $0x150] sm:$0xff]  ;;  %v1589_v10 = vld [vmem:[#allocation7 + $0x158] sm:$0xff]  ;;  %v2306_v12 = vpack.c.bf16 %v1557_v8, %v1556_v7  ;;  %v1558_v14 = vld [vmem:[#allocation7 + $0x60] sm:$0xff] }
  0x8d   : > { %v2354_v13 = vpack.c.bf16 %v1589_v10, %v1588_v9  ;;  %v1559_v15 = vld [vmem:[#allocation7 + $0x68] sm:$0xff]  ;;  %v1590_v16 = vld [vmem:[#allocation7 + $0x160] sm:$0xff]  ;;  %v280_v18 = vld [vmem:[%s3165_s14 + $0x30] sm:$0xff] }
  0x8e   : > { %2257 = vmatpush1.bf16.msra.mxu0 %v2256_v32  ;;  %v1591_v17 = vld [vmem:[#allocation7 + $0x168] sm:$0xff]  ;;  %v2309_v19 = vpack.c.bf16 %v1559_v15, %v1558_v14  ;;  %v1560_v21 = vld [vmem:[#allocation7 + $0x70] sm:$0xff]  ;;  %v1561_v22 = vld [vmem:[#allocation7 + $0x78] sm:$0xff] }
  0x8f   : > { %2289 = vmatpush1.bf16.msra.mxu1 %v2288_v33  ;;  %2338 = vmatprep.subr.bf16.mxu0 %v2947_v40  ;;  %v2357_v20 = vpack.c.bf16 %v1591_v17, %v1590_v16  ;;  %v1592_v23 = vld [vmem:[#allocation7 + $0x170] sm:$0xff]  ;;  %v1593_v24 = vld [vmem:[#allocation7 + $0x178] sm:$0xff]  ;;  %v2312_v26 = vpack.c.bf16 %v1561_v22, %v1560_v21  ;;  %v1562_v28 = vld [vmem:[#allocation7 + $0x80] sm:$0xff] }
  0x90   : > { %2290 = vmatprep.subr.bf16.mxu1 %v2947_v40  ;;  %v281_v25 = vld [vmem:[%s3165_s14 + $0x38] sm:$0xff]  ;;  %v2360_v27 = vpack.c.bf16 %v1593_v24, %v1592_v23  ;;  %v1563_v29 = vld [vmem:[#allocation7 + $0x88] sm:$0xff]  ;;  %v1594_v30 = vld [vmem:[#allocation7 + $0x180] sm:$0xff] }
  0x91   : > { %457 = vmatmul.mubr.f32.vlgmr.msra.gmra.mrb[0].mxu0 %v274_v38  ;;  %v1595_v31 = vld [vmem:[#allocation7 + $0x188] sm:$0xff]  ;;  %v282_v32 = vld [vmem:[%s3165_s14 + $0x40] sm:$0xff]  ;;  %v2315_v33 = vpack.c.bf16 %v1563_v29, %v1562_v28  ;;  %v1564_v35 = vld [vmem:[#allocation7 + $0x90] sm:$0xff] }
  0x92   : > { %714 = vmatmul.mubr.f32.vlgmr.msra.gmra.mrb[0].mxu1 %v274_v38  ;;  %462 = vmatprep.mubr.f32.mxu0 %v2946_v0  ;;  %v2363_v34 = vpack.c.bf16 %v1595_v31, %v1594_v30  ;;  %v1565_v36 = vld [vmem:[#allocation7 + $0x98] sm:$0xff]  ;;  %v1596_v37 = vld [vmem:[#allocation7 + $0x190] sm:$0xff]  ;;  %v1566_v43 = vld [vmem:[#allocation7 + $0xa0] sm:$0xff] }
  0x93   : > { %719 = vmatprep.mubr.f32.mxu1 %v2946_v0  ;;  %2292 = vmatpush1.bf16.msra.mxu1 %v2291_v39  ;;  %v1597_v38 = vld [vmem:[#allocation7 + $0x198] sm:$0xff]  ;;  %v283_v39 = vld [vmem:[%s3165_s14 + $0x48] sm:$0xff]  ;;  %v1598_v45 = vld [vmem:[#allocation7 + $0x1a0] sm:$0xff] }
  0x94   : > { %2340 = vmatpush1.bf16.msra.mxu0 %v2339_v41  ;;  %2293 = vmatprep.subr.bf16.mxu1 %v2947_v40  ;;  %v2318_v41 = vpack.c.bf16 %v1565_v36, %v1564_v35  ;;  %v2366_v42 = vpack.c.bf16 %v1597_v38, %v1596_v37  ;;  %v1567_v44 = vld [vmem:[#allocation7 + $0xa8] sm:$0xff]  ;;  %v1568_v50 = vld [vmem:[#allocation7 + $0xb0] sm:$0xff]  ;;  %v1569_v51 = vld [vmem:[#allocation7 + $0xb8] sm:$0xff]  ;;  %v372_v37 = vlaneseq }
  0x95   : > { %463 = vmatmul.mubr.f32.gmra.mrb[2].mxu0 %v275_v46  ;;  %2341 = vmatprep.subr.bf16.mxu0 %v2947_v40  ;;  %v1600_v52 = vld [vmem:[#allocation7 + $0x1b0] sm:$0xff]  ;;  %v1570_v57 = vld [vmem:[#allocation7 + $0xc0] sm:$0xff]  ;;  %v1571_v58 = vld [vmem:[#allocation7 + $0xc8] sm:$0xff] }
  0x96   : > { %720 = vmatmul.mubr.f32.gmra.mrb[2].mxu1 %v275_v46  ;;  %468 = vmatprep.mubr.f32.mxu0 %v2946_v0  ;;  %v1599_v46 = vld [vmem:[#allocation7 + $0x1a8] sm:$0xff]  ;;  %v1602_v59 = vld [vmem:[#allocation7 + $0x1c0] sm:$0xff]  ;;  %v1572_v1 = vld [vmem:[#allocation7 + $0xd0] sm:$0xff]  ;;  %v373_v38 = vshrl.u32 %v372_v37, 7 }
  0x97   : > { %725 = vmatprep.mubr.f32.mxu1 %v2946_v0  ;;  %2295 = vmatpush1.bf16.msra.mxu1 %v2294_v47  ;;  %v284_v47 = vld [vmem:[%s3165_s14 + $0x50] sm:$0xff]  ;;  %v2369_v49 = vpack.c.bf16 %v1599_v46, %v1598_v45  ;;  %v1573_v2 = vld [vmem:[#allocation7 + $0xd8] sm:$0xff]  ;;  %v287_v3 = vld [vmem:[%s3165_s14 + $0x68] sm:$0xff] }
  0x98   : > { %2343 = vmatpush1.bf16.msra.mxu0 %v2342_v48  ;;  %2296 = vmatprep.subr.bf16.mxu1 %v2947_v40  ;;  %v2321_v48 = vpack.c.bf16 %v1567_v44, %v1566_v43  ;;  %v290_v7 = vld [vmem:[%s3165_s14 + $0x80] sm:$0xff]  ;;  %v291_v8 = vld [vmem:[%s3165_s14 + $0x88] sm:$0xff]  ;;  %v292_v9 = vld [vmem:[%s3165_s14 + $0x90] sm:$0xff]  ;;  %v378_v43 = vsub.s32 1, %v373_v38  ;;  %v386_v45 = vsub.s32 3, %v373_v38 }
  0x99   : > { %469 = vmatmul.mubr.f32.gmra.mrb[4].mxu0 %v276_v53  ;;  %2344 = vmatprep.subr.bf16.mxu0 %v2947_v40  ;;  %v293_v10 = vld [vmem:[%s3165_s14 + $0x98] sm:$0xff]  ;;  %v1604_v15 = vld [vmem:[#allocation7 + $0x1d0] sm:$0xff]  ;;  %v298_v17 = vld [vmem:[%s3165_s14 + $0xc0] sm:$0xff] }
  0x9a   : > { %726 = vmatmul.mubr.f32.gmra.mrb[4].mxu1 %v276_v53  ;;  %474 = vmatprep.mubr.f32.mxu0 %v2946_v0  ;;  %v1601_v53 = vld [vmem:[#allocation7 + $0x1b8] sm:$0xff]  ;;  %v1575_v21 = vld [vmem:[#allocation7 + $0xe8] sm:$0xff]  ;;  %v1606_v22 = vld [vmem:[#allocation7 + $0x1e0] sm:$0xff] }
  0x9b   : > { %731 = vmatprep.mubr.f32.mxu1 %v2946_v0  ;;  %2298 = vmatpush1.bf16.msra.mxu1 %v2297_v54  ;;  %v285_v54 = vld [vmem:[%s3165_s14 + $0x58] sm:$0xff]  ;;  %v2372_v56 = vpack.c.bf16 %v1601_v53, %v1600_v52  ;;  %v1607_v24 = vld [vmem:[#allocation7 + $0x1e8] sm:$0xff]  ;;  %v1608_v29 = vld [vmem:[#allocation7 + $0x1f0] sm:$0xff] }
  0x9c   : > { %2346 = vmatpush1.bf16.msra.mxu0 %v2345_v55  ;;  %2299 = vmatprep.subr.bf16.mxu1 %v2947_v40  ;;  %v2324_v55 = vpack.c.bf16 %v1569_v51, %v1568_v50  ;;  %v297_v14 = vld [vmem:[%s3165_s14 + $0xb8] sm:$0xff]  ;;  %v304_v35 = vld [vmem:[%s3165_s14 + $0xf0] sm:$0xff] }
  0x9d   : > { %475 = vmatmul.mubr.f32.gmra.mrb[6].mxu0 %v277_v60  ;;  %2347 = vmatprep.subr.bf16.mxu0 %v2947_v40  ;;  %v1605_v16 = vld [vmem:[#allocation7 + $0x1d8] sm:$0xff] }
  0x9e   : > { %732 = vmatmul.mubr.f32.gmra.mrb[6].mxu1 %v277_v60  ;;  %480 = vmatprep.mubr.f32.mxu0 %v2946_v0  ;;  %v1603_v60 = vld [vmem:[#allocation7 + $0x1c8] sm:$0xff]  ;;  %v1577_v28 = vld [vmem:[#allocation7 + $0xf8] sm:$0xff] }
  0x9f   : > { %737 = vmatprep.mubr.f32.mxu1 %v2946_v0  ;;  %2301 = vmatpush1.bf16.msra.mxu1 %v2300_v61  ;;  %v286_v61 = vld [vmem:[%s3165_s14 + $0x60] sm:$0xff]  ;;  %v2375_v63 = vpack.c.bf16 %v1603_v60, %v1602_v59  ;;  %v301_v30 = vld [vmem:[%s3165_s14 + $0xd8] sm:$0xff] }
  0xa0   : > { %2349 = vmatpush1.bf16.msra.mxu0 %v2348_v62  ;;  %2302 = vmatprep.subr.bf16.mxu1 %v2947_v40  ;;  %v2327_v62 = vpack.c.bf16 %v1571_v58, %v1570_v57  ;;  %v305_v36 = vld [vmem:[%s3165_s14 + $0xf8] sm:$0xff] }
  0xa1   : > { %481 = vmatmul.mubr.f32.gmra.mrb[8].mxu0 %v278_v4  ;;  %2350 = vmatprep.subr.bf16.mxu0 %v2947_v40 }
  0xa2   : > { %738 = vmatmul.mubr.f32.gmra.mrb[8].mxu1 %v278_v4  ;;  %486 = vmatprep.mubr.f32.mxu0 %v2946_v0  ;;  %v2330_v4 = vpack.c.bf16 %v1573_v2, %v1572_v1 }
  0xa3   : > { %743 = vmatprep.mubr.f32.mxu1 %v2946_v0  ;;  %2304 = vmatpush1.bf16.msra.mxu1 %v2303_v5  ;;  %v288_v5 = vld [vmem:[%s3165_s14 + $0x70] sm:$0xff] }
  0xa4   : > { %2352 = vmatpush1.bf16.msra.mxu0 %v2351_v6  ;;  %2305 = vmatprep.subr.bf16.mxu1 %v2947_v40  ;;  %v289_v6 = vld [vmem:[%s3165_s14 + $0x78] sm:$0xff] }
  0xa5   : > { %487 = vmatmul.mubr.f32.gmra.mrb[10].mxu0 %v279_v11  ;;  %2353 = vmatprep.subr.bf16.mxu0 %v2947_v40 }
  0xa6   : > { %744 = vmatmul.mubr.f32.gmra.mrb[10].mxu1 %v279_v11  ;;  %492 = vmatprep.mubr.f32.mxu0 %v2946_v0  ;;  %v294_v11 = vld [vmem:[%s3165_s14 + $0xa0] sm:$0xff] }
  0xa7   : > { %749 = vmatprep.mubr.f32.mxu1 %v2946_v0  ;;  %2307 = vmatpush1.bf16.msra.mxu1 %v2306_v12  ;;  %v295_v12 = vld [vmem:[%s3165_s14 + $0xa8] sm:$0xff] }
  0xa8   : > { %2355 = vmatpush1.bf16.msra.mxu0 %v2354_v13  ;;  %2308 = vmatprep.subr.bf16.mxu1 %v2947_v40  ;;  %v296_v13 = vld [vmem:[%s3165_s14 + $0xb0] sm:$0xff] }
  0xa9   : > { %493 = vmatmul.mubr.f32.gmra.mrb[12].mxu0 %v280_v18  ;;  %2356 = vmatprep.subr.bf16.mxu0 %v2947_v40 }
  0xaa   : > { %750 = vmatmul.mubr.f32.gmra.mrb[12].mxu1 %v280_v18  ;;  %498 = vmatprep.mubr.f32.mxu0 %v2946_v0  ;;  %v2378_v18 = vpack.c.bf16 %v1605_v16, %v1604_v15 }
  0xab   : > { %755 = vmatprep.mubr.f32.mxu1 %v2946_v0  ;;  %2310 = vmatpush1.bf16.msra.mxu1 %v2309_v19  ;;  %v299_v19 = vld [vmem:[%s3165_s14 + $0xc8] sm:$0xff] }
  0xac   : > { %2358 = vmatpush1.bf16.msra.mxu0 %v2357_v20  ;;  %2311 = vmatprep.subr.bf16.mxu1 %v2947_v40  ;;  %v1574_v20 = vld [vmem:[#allocation7 + $0xe0] sm:$0xff] }
  0xad   : > { %499 = vmatmul.mubr.f32.gmra.mrb[14].mxu0 %v281_v25  ;;  %2359 = vmatprep.subr.bf16.mxu0 %v2947_v40  ;;  %v2333_v23 = vpack.c.bf16 %v1575_v21, %v1574_v20 }
  0xae   : > { %756 = vmatmul.mubr.f32.gmra.mrb[14].mxu1 %v281_v25  ;;  %504 = vmatprep.mubr.f32.mxu0 %v2946_v0  ;;  %v2381_v25 = vpack.c.bf16 %v1607_v24, %v1606_v22 }
  0xaf   : > { %761 = vmatprep.mubr.f32.mxu1 %v2946_v0  ;;  %2313 = vmatpush1.bf16.msra.mxu1 %v2312_v26  ;;  %v300_v26 = vld [vmem:[%s3165_s14 + $0xd0] sm:$0xff] }
  0xb0   : > { %2361 = vmatpush1.bf16.msra.mxu0 %v2360_v27  ;;  %2314 = vmatprep.subr.bf16.mxu1 %v2947_v40  ;;  %v1576_v27 = vld [vmem:[#allocation7 + $0xf0] sm:$0xff] }
  0xb1   : > { %505 = vmatmul.mubr.f32.gmra.mrb[16].mxu0 %v282_v32  ;;  %2362 = vmatprep.subr.bf16.mxu0 %v2947_v40  ;;  %v2336_v31 = vpack.c.bf16 %v1577_v28, %v1576_v27 }
  0xb2   : > { %762 = vmatmul.mubr.f32.gmra.mrb[16].mxu1 %v282_v32  ;;  %510 = vmatprep.mubr.f32.mxu0 %v2946_v0  ;;  %v1609_v32 = vld [vmem:[#allocation7 + $0x1f8] sm:$0xff] }
  0xb3   : > { %767 = vmatprep.mubr.f32.mxu1 %v2946_v0  ;;  %2316 = vmatpush1.bf16.msra.mxu1 %v2315_v33  ;;  %v2384_v33 = vpack.c.bf16 %v1609_v32, %v1608_v29 }
  0xb4   : > { %2364 = vmatpush1.bf16.msra.mxu0 %v2363_v34  ;;  %2317 = vmatprep.subr.bf16.mxu1 %v2947_v40  ;;  %v302_v34 = vld [vmem:[%s3165_s14 + $0xe0] sm:$0xff] }
  0xb5   : > { %511 = vmatmul.mubr.f32.gmra.mrb[18].mxu0 %v283_v39  ;;  %2365 = vmatprep.subr.bf16.mxu0 %v2947_v40 }
  0xb6   : > { %768 = vmatmul.mubr.f32.gmra.mrb[18].mxu1 %v283_v39  ;;  %516 = vmatprep.mubr.f32.mxu0 %v2946_v0  ;;  %v374_v39 = vsub.s32 0, %v373_v38 }
  0xb7   : > { %773 = vmatprep.mubr.f32.mxu1 %v2946_v0  ;;  %2319 = vmatpush1.bf16.msra.mxu1 %v2318_v41  ;;  %v370_v41 = vld [vmem:[%s4384_s2] sm:$0xf] }
  0xb8   : > { %2367 = vmatpush1.bf16.msra.mxu0 %v2366_v42  ;;  %2320 = vmatprep.subr.bf16.mxu1 %v2947_v40  ;;  %v382_v42 = vsub.s32 2, %v373_v38  ;;  %v3306_v44 = vrot.slane %v370_v41, %v374_v39  ;;  %v3313_v51 = vrot.slane %v370_v41, %v386_v45 }
  0xb9   : > { %517 = vmatmul.mubr.f32.gmra.mrb[20].mxu0 %v284_v47  ;;  %2368 = vmatprep.subr.bf16.mxu0 %v2947_v40 }
  0xba   : > { %774 = vmatmul.mubr.f32.gmra.mrb[20].mxu1 %v284_v47  ;;  %522 = vmatprep.mubr.f32.mxu0 %v2946_v0  ;;  %v3308_v46 = vrot.slane %v370_v41, %v382_v42 }
  0xbb   : > { %779 = vmatprep.mubr.f32.mxu1 %v2946_v0  ;;  %2322 = vmatpush1.bf16.msra.mxu1 %v2321_v48  ;;  %v3310_v48 = vrot.slane %v370_v41, %v378_v43 }
  0xbc   : > { %2370 = vmatpush1.bf16.msra.mxu0 %v2369_v49  ;;  %2323 = vmatprep.subr.bf16.mxu1 %v2947_v40 }
  0xbd   : > { %523 = vmatmul.mubr.f32.gmra.mrb[22].mxu0 %v285_v54  ;;  %2371 = vmatprep.subr.bf16.mxu0 %v2947_v40 }
  0xbe   : > { %780 = vmatmul.mubr.f32.gmra.mrb[22].mxu1 %v285_v54  ;;  %528 = vmatprep.mubr.f32.mxu0 %v2946_v0 }
  0xbf   : > { %785 = vmatprep.mubr.f32.mxu1 %v2946_v0  ;;  %2325 = vmatpush1.bf16.msra.mxu1 %v2324_v55 }
  0xc0   : > { %2373 = vmatpush1.bf16.msra.mxu0 %v2372_v56  ;;  %2326 = vmatprep.subr.bf16.mxu1 %v2947_v40 }
  0xc1   : > { %529 = vmatmul.mubr.f32.gmra.mrb[24].mxu0 %v286_v61  ;;  %2374 = vmatprep.subr.bf16.mxu0 %v2947_v40 }
  0xc2   : > { %786 = vmatmul.mubr.f32.gmra.mrb[24].mxu1 %v286_v61  ;;  %534 = vmatprep.mubr.f32.mxu0 %v2946_v0 }
  0xc3   : > { %791 = vmatprep.mubr.f32.mxu1 %v2946_v0  ;;  %2328 = vmatpush1.bf16.msra.mxu1 %v2327_v62 }
  0xc4   : > { %2376 = vmatpush1.bf16.msra.mxu0 %v2375_v63  ;;  %2329 = vmatprep.subr.bf16.mxu1 %v2947_v40 }
  0xc5   : > { %535 = vmatmul.mubr.f32.gmra.mrb[26].mxu0 %v287_v3  ;;  %2377 = vmatprep.subr.bf16.mxu0 %v2947_v40 }
  0xc6   : > { %792 = vmatmul.mubr.f32.gmra.mrb[26].mxu1 %v287_v3  ;;  %540 = vmatprep.mubr.f32.mxu0 %v2946_v0 }
  0xc7   : > { %797 = vmatprep.mubr.f32.mxu1 %v2946_v0  ;;  %2331 = vmatpush1.bf16.msra.mxu1 %v2330_v4 }
  0xc8   : > { %2332 = vmatprep.subr.bf16.mxu1 %v2947_v40  ;;  %2379 = vmatpush1.bf16.msra.mxu0 %v2378_v18 }
  0xc9   : > { %541 = vmatmul.mubr.f32.gmra.mrb[28].mxu0 %v288_v5  ;;  %2380 = vmatprep.subr.bf16.mxu0 %v2947_v40 }
  0xca   : > { %798 = vmatmul.mubr.f32.gmra.mrb[28].mxu1 %v288_v5  ;;  %546 = vmatprep.mubr.f32.mxu0 %v2946_v0 }
  0xcb   : > { %803 = vmatprep.mubr.f32.mxu1 %v2946_v0  ;;  %2334 = vmatpush1.bf16.msra.mxu1 %v2333_v23 }
  0xcc   : > { %2382 = vmatpush1.bf16.msra.mxu0 %v2381_v25  ;;  %2335 = vmatprep.subr.bf16.mxu1 %v2947_v40 }
  0xcd   : > { %547 = vmatmul.mubr.f32.gmra.mrb[30].mxu0 %v289_v6  ;;  %2383 = vmatprep.subr.bf16.mxu0 %v2947_v40  ;;  %v303_v40 = vld [vmem:[%s3165_s14 + $0xe8] sm:$0xff] }
  0xce   : > { %804 = vmatmul.mubr.f32.gmra.mrb[30].mxu1 %v289_v6  ;;  %552 = vmatprep.mubr.f32.mxu0 %v2946_v0 }
  0xcf   : > { %809 = vmatprep.mubr.f32.mxu1 %v2946_v0  ;;  %2337 = vmatpush1.bf16.msra.mxu1 %v2336_v31 }
  0xd0   : > { %2385 = vmatpush1.bf16.msra.mxu0 %v2384_v33 }
  0xd1   : > { %553 = vmatmul.mubr.f32.gmra.mrb[32].mxu0 %v290_v7 }
  0xd2   : > { %810 = vmatmul.mubr.f32.gmra.mrb[32].mxu1 %v290_v7  ;;  %558 = vmatprep.mubr.f32.mxu0 %v2946_v0 }
  0xd3   : > { %815 = vmatprep.mubr.f32.mxu1 %v2946_v0 }
  0xd5   : > { %559 = vmatmul.mubr.f32.gmra.mrb[34].mxu0 %v291_v8 }
  0xd6   : > { %816 = vmatmul.mubr.f32.gmra.mrb[34].mxu1 %v291_v8  ;;  %564 = vmatprep.mubr.f32.mxu0 %v2946_v0 }
  0xd7   : > { %821 = vmatprep.mubr.f32.mxu1 %v2946_v0 }
  0xd9   : > { %565 = vmatmul.mubr.f32.gmra.mrb[36].mxu0 %v292_v9 }
  0xda   : > { %822 = vmatmul.mubr.f32.gmra.mrb[36].mxu1 %v292_v9  ;;  %570 = vmatprep.mubr.f32.mxu0 %v2946_v0 }
  0xdb   : > { %827 = vmatprep.mubr.f32.mxu1 %v2946_v0 }
  0xdd   : > { %571 = vmatmul.mubr.f32.gmra.mrb[38].mxu0 %v293_v10 }
  0xde   : > { %828 = vmatmul.mubr.f32.gmra.mrb[38].mxu1 %v293_v10  ;;  %576 = vmatprep.mubr.f32.mxu0 %v2946_v0 }
  0xdf   : > { %833 = vmatprep.mubr.f32.mxu1 %v2946_v0 }
  0xe1   : > { %577 = vmatmul.mubr.f32.gmra.mrb[40].mxu0 %v294_v11 }
  0xe2   : > { %834 = vmatmul.mubr.f32.gmra.mrb[40].mxu1 %v294_v11  ;;  %582 = vmatprep.mubr.f32.mxu0 %v2946_v0 }
  0xe3   : > { %839 = vmatprep.mubr.f32.mxu1 %v2946_v0 }
  0xe5   : > { %583 = vmatmul.mubr.f32.gmra.mrb[42].mxu0 %v295_v12 }
  0xe6   : > { %840 = vmatmul.mubr.f32.gmra.mrb[42].mxu1 %v295_v12  ;;  %588 = vmatprep.mubr.f32.mxu0 %v2946_v0 }
  0xe7   : > { %845 = vmatprep.mubr.f32.mxu1 %v2946_v0 }
  0xe9   : > { %589 = vmatmul.mubr.f32.gmra.mrb[44].mxu0 %v296_v13 }
  0xea   : > { %846 = vmatmul.mubr.f32.gmra.mrb[44].mxu1 %v296_v13  ;;  %594 = vmatprep.mubr.f32.mxu0 %v2946_v0 }
  0xeb   : > { %851 = vmatprep.mubr.f32.mxu1 %v2946_v0 }
  0xed   : > { %595 = vmatmul.mubr.f32.gmra.mrb[46].mxu0 %v297_v14 }
  0xee   : > { %852 = vmatmul.mubr.f32.gmra.mrb[46].mxu1 %v297_v14  ;;  %600 = vmatprep.mubr.f32.mxu0 %v2946_v0 }
  0xef   : > { %857 = vmatprep.mubr.f32.mxu1 %v2946_v0 }
  0xf1   : > { %601 = vmatmul.mubr.f32.gmra.mrb[48].mxu0 %v298_v17 }
  0xf2   : > { %858 = vmatmul.mubr.f32.gmra.mrb[48].mxu1 %v298_v17  ;;  %606 = vmatprep.mubr.f32.mxu0 %v2946_v0 }
  0xf3   : > { %863 = vmatprep.mubr.f32.mxu1 %v2946_v0 }
  0xf5   : > { %607 = vmatmul.mubr.f32.gmra.mrb[50].mxu0 %v299_v19 }
  0xf6   : > { %864 = vmatmul.mubr.f32.gmra.mrb[50].mxu1 %v299_v19  ;;  %612 = vmatprep.mubr.f32.mxu0 %v2946_v0 }
  0xf7   : > { %869 = vmatprep.mubr.f32.mxu1 %v2946_v0 }
  0xf9   : > { %613 = vmatmul.mubr.f32.gmra.mrb[52].mxu0 %v300_v26 }
  0xfa   : > { %870 = vmatmul.mubr.f32.gmra.mrb[52].mxu1 %v300_v26  ;;  %618 = vmatprep.mubr.f32.mxu0 %v2946_v0 }
  0xfb   : > { %875 = vmatprep.mubr.f32.mxu1 %v2946_v0 }
  0xfd   : > { %619 = vmatmul.mubr.f32.gmra.mrb[54].mxu0 %v301_v30 }
  0xfe   : > { %876 = vmatmul.mubr.f32.gmra.mrb[54].mxu1 %v301_v30  ;;  %624 = vmatprep.mubr.f32.mxu0 %v2946_v0 }
  0xff   : > { %881 = vmatprep.mubr.f32.mxu1 %v2946_v0 }
 0x101   : > { %625 = vmatmul.mubr.f32.gmra.mrb[56].mxu0 %v302_v34 }
 0x102   : > { %882 = vmatmul.mubr.f32.gmra.mrb[56].mxu1 %v302_v34  ;;  %630 = vmatprep.mubr.f32.mxu0 %v2946_v0 }
 0x103   : > { %887 = vmatprep.mubr.f32.mxu1 %v2946_v0 }
 0x105   : > { %631 = vmatmul.mubr.f32.gmra.mrb[58].mxu0 %v303_v40 }
 0x106   : > { %888 = vmatmul.mubr.f32.gmra.mrb[58].mxu1 %v303_v40  ;;  %636 = vmatprep.mubr.f32.mxu0 %v2946_v0 }
 0x107   : > { %893 = vmatprep.mubr.f32.mxu1 %v2946_v0 }
 0x109   : > { %637 = vmatmul.mubr.f32.gmra.mrb[60].mxu0 %v304_v35 }
 0x10a   : > { %894 = vmatmul.mubr.f32.gmra.mrb[60].mxu1 %v304_v35  ;;  %642 = vmatprep.mubr.f32.mxu0 %v2946_v0 }
 0x10b   : > { %899 = vmatprep.mubr.f32.mxu1 %v2946_v0 }
 0x10d   : > { %643 = vmatmul.mubr.f32.gmra.mrb[62].mxu0 %v305_v36 }
 0x10e   : > { %900 = vmatmul.mubr.f32.gmra.mrb[62].mxu1 %v305_v36 }
 0x164   : > { %v458_v47 = vpop.f32.mrb[0].mxu0 }
 0x165   : > { %v459_v0 = vadd.f32 %v458_v47, %v3306_v44  ;;  %v715_v49 = vpop.f32.mrb[0].mxu1  ;;  %v460_v50 = vpop.f32.mrb[1].mxu0 }
 0x166   : > { %v716_v52 = vadd.f32 %v715_v49, %v3308_v46  ;;  %v717_v53 = vpop.f32.mrb[1].mxu1  ;;  %v461_v55 = vadd.f32 %v460_v50, %v3310_v48 }
 0x167   : > { %v1034_v54 = vmul.f32 0.70710677, %v459_v0  ;;  %v718_v57 = vadd.f32 %v717_v53, %v3313_v51  ;;  %v906_v23 = vmul.f32 0.5, %v459_v0 }
 0x168   : > { %v1036_v56 = vmul.f32 0.70710677, %v716_v52  ;;  %v464_v58 = vpop.f32.mrb[2].mxu0  ;;  %v1035_v1 = vmul.f32 0.70710677, %v461_v55  ;;  %v908_v29 = vmul.f32 0.5, %v716_v52 }
 0x169   : > { %v721_v59 = vpop.f32.mrb[2].mxu1  ;;  %v465_v60 = vadd.f32 %v464_v58, %v3306_v44  ;;  %v466_v61 = vpop.f32.mrb[3].mxu0  ;;  %2525 = verf.f32 %v1034_v54  ;;  %v1037_v4 = vmul.f32 0.70710677, %v718_v57  ;;  %v3327_v30 = vmul.f32 0.5, %v461_v55 }
 0x16a   : > { %v723_v62 = vpop.f32.mrb[3].mxu1  ;;  %v722_v63 = vadd.f32 %v721_v59, %v3308_v46  ;;  %v467_v2 = vadd.f32 %v466_v61, %v3310_v48  ;;  %2527 = verf.f32 %v1036_v56  ;;  %v3330_v40 = vmul.f32 0.5, %v718_v57 }
 0x16b   : > { %v724_v5 = vadd.f32 %v723_v62, %v3313_v51  ;;  %v1038_v6 = vmul.f32 0.70710677, %v465_v60  ;;  %2529 = verf.f32 %v1035_v1  ;;  %v3332_v35 = vmul.f32 0.5, %v465_v60 }
 0x16c   : > { %v470_v3 = vpop.f32.mrb[4].mxu0  ;;  %v1040_v9 = vmul.f32 0.70710677, %v722_v63  ;;  %v1039_v11 = vmul.f32 0.70710677, %v467_v2  ;;  %2531 = verf.f32 %v1037_v4  ;;  %v3335_v38 = vmul.f32 0.5, %v722_v63 }
 0x16d   : > { %v727_v7 = vpop.f32.mrb[4].mxu1  ;;  %v472_v8 = vpop.f32.mrb[5].mxu0  ;;  %v471_v12 = vadd.f32 %v470_v3, %v3306_v44  ;;  %v1041_v14 = vmul.f32 0.70710677, %v724_v5  ;;  %2533 = verf.f32 %v1038_v6  ;;  %v3337_v39 = vmul.f32 0.5, %v467_v2 }
 0x16e   : > { %v729_v10 = vpop.f32.mrb[5].mxu1  ;;  %v728_v15 = vadd.f32 %v727_v7, %v3308_v46  ;;  %v473_v18 = vadd.f32 %v472_v8, %v3310_v48  ;;  %2535 = verf.f32 %v1040_v9  ;;  %v3340_v45 = vmul.f32 0.5, %v724_v5 }
 0x16f   : > { %v730_v20 = vadd.f32 %v729_v10, %v3313_v51  ;;  %2537 = verf.f32 %v1039_v11  ;;  %v1042_v21 = vmul.f32 0.70710677, %v471_v12  ;;  %v3344_v53 = vmul.f32 0.5, %v471_v12 }
 0x170   : > { %v476_v13 = vpop.f32.mrb[6].mxu0  ;;  %2539 = verf.f32 %v1041_v14  ;;  %v1044_v24 = vmul.f32 0.70710677, %v728_v15  ;;  %v1043_v31 = vmul.f32 0.70710677, %v473_v18  ;;  %v3348_v57 = vmul.f32 0.5, %v728_v15 }
 0x171   : > { %v733_v16 = vpop.f32.mrb[6].mxu1  ;;  %v478_v17 = vpop.f32.mrb[7].mxu0  ;;  %v477_v25 = vadd.f32 %v476_v13, %v3306_v44  ;;  %v1045_v36 = vmul.f32 0.70710677, %v730_v20  ;;  %2541 = verf.f32 %v1042_v21  ;;  %v3350_v58 = vmul.f32 0.5, %v473_v18 }
 0x172   : > { %v735_v19 = vpop.f32.mrb[7].mxu1  ;;  %v734_v32 = vadd.f32 %v733_v16, %v3308_v46  ;;  %v479_v37 = vadd.f32 %v478_v17, %v3310_v48  ;;  %2543 = verf.f32 %v1044_v24  ;;  %v3352_v61 = vmul.f32 0.5, %v730_v20 }
 0x173   : > { %v2526_v28 = vpop.eup %2525  ;;  %v736_v41 = vadd.f32 %v735_v19, %v3313_v51  ;;  %v1046_v47 = vmul.f32 0.70710677, %v477_v25  ;;  %2545 = verf.f32 %v1043_v31  ;;  %v3354_v62 = vmul.f32 0.5, %v477_v25 }
 0x174   : > { %v482_v22 = vpop.f32.mrb[8].mxu0  ;;  %v2528_v34 = vpop.eup %2527  ;;  %v1290_v43 = vadd.f32 1.0, %v2526_v28  ;;  %v1048_v54 = vmul.f32 0.70710677, %v734_v32  ;;  %2547 = verf.f32 %v1045_v36  ;;  %v1047_v59 = vmul.f32 0.70710677, %v479_v37 }
 0x175   : > { %v739_v26 = vpop.f32.mrb[8].mxu1  ;;  %v484_v27 = vpop.f32.mrb[9].mxu0  ;;  %v1292_v52 = vadd.f32 1.0, %v2528_v34  ;;  %v1049_v63 = vmul.f32 0.70710677, %v736_v41  ;;  %v483_v1 = vadd.f32 %v482_v22, %v3306_v44  ;;  %2549 = verf.f32 %v1046_v47 }
 0x176   : > { %v741_v33 = vpop.f32.mrb[9].mxu1  ;;  %v2530_v50 = vpop.eup %2529  ;;  %v1418_v4 = vmul.f32 %v1290_v43, %v906_v23  ;;  %v740_v6 = vadd.f32 %v739_v26, %v3308_v46  ;;  %v3362_v11 = vmul.f32 0.5, %v734_v32  ;;  %2551 = verf.f32 %v1048_v54 }
 0x177   : > { %v2532_v56 = vpop.eup %2531  ;;  %v1291_v5 = vadd.f32 1.0, %v2530_v50  ;;  %v1420_v10 = vmul.f32 %v1292_v52, %v908_v29  ;;  %v485_v12 = vadd.f32 %v484_v27, %v3310_v48  ;;  %v3367_v16 = vmul.f32 0.5, %v479_v37 }
 0x178   : > { %v488_v42 = vpop.f32.mrb[10].mxu0  ;;  %v2534_v60 = vpop.eup %2533  ;;  %v1293_v15 = vadd.f32 1.0, %v2532_v56  ;;  %2553 = verf.f32 %v1047_v59  ;;  %v742_v17 = vadd.f32 %v741_v33, %v3313_v51  ;;  %v3370_v18 = vmul.f32 0.5, %v736_v41 }
 0x179   : > { %v745_v0 = vpop.f32.mrb[10].mxu1  ;;  %v3342_v49 = vpop.f32.mrb[11].mxu0  ;;  %2555 = verf.f32 %v1049_v63  ;;  %v1050_v19 = vmul.f32 0.70710677, %v483_v1  ;;  %v489_v20 = vadd.f32 %v488_v42, %v3306_v44  ;;  %v1294_v22 = vadd.f32 1.0, %v2534_v60 }
 0x17a   : > { %v3346_v55 = vpop.f32.mrb[11].mxu1  ;;  %v2536_v3 = vpop.eup %2535  ;;  %v1052_v24 = vmul.f32 0.70710677, %v740_v6  ;;  %v1419_v25 = vmul.f32 %v1291_v5, %v3327_v30  ;;  %v3380_v32 = vmul.f32 0.5, %v483_v1  ;;  %v1051_v33 = vmul.f32 0.70710677, %v485_v12 }
 0x17b   : > { %v2538_v9 = vpop.eup %2537  ;;  %v1296_v29 = vadd.f32 1.0, %v2536_v3  ;;  %v3384_v37 = vmul.f32 0.5, %v740_v6  ;;  %v1053_v41 = vmul.f32 0.70710677, %v742_v17  ;;  %v746_v42 = vadd.f32 %v745_v0, %v3308_v46 }
 0x17c   : > { %v494_v2 = vpop.f32.mrb[12].mxu0  ;;  %v2540_v14 = vpop.eup %2539  ;;  %v1295_v23 = vadd.f32 1.0, %v2538_v9  ;;  %1681 = vmatprep.mubr.f32.mxu1 %v1419_v25  ;;  %v1421_v30 = vmul.f32 %v1293_v15, %v3330_v40  ;;  %2557 = verf.f32 %v1050_v19  ;;  %v3388_v47 = vmul.f32 0.5, %v485_v12 }
 0x17d   : > { %v3358_v7 = vpop.f32.mrb[12].mxu1  ;;  %v3360_v8 = vpop.f32.mrb[13].mxu0  ;;  %v1297_v31 = vadd.f32 1.0, %v2540_v14  ;;  %v1054_v50 = vmul.f32 0.70710677, %v489_v20  ;;  %v491_v52 = vadd.f32 %v3342_v49, %v3310_v48  ;;  %1682 = vmatmul.mubr.f32.vlgmr.msra.gmra.mrb[64].mxu1 %v1418_v4  ;;  %2559 = verf.f32 %v1052_v24 }
 0x17e   : > { %v3365_v13 = vpop.f32.mrb[13].mxu1  ;;  %v2542_v28 = vpop.eup %2541  ;;  %v748_v0 = vadd.f32 %v3346_v55, %v3313_v51  ;;  %1906 = vmatprep.mubr.f32.mxu0 %v1421_v30  ;;  %v1423_v40 = vmul.f32 %v1295_v23, %v3337_v39  ;;  %2561 = verf.f32 %v1051_v33  ;;  %v3405_v49 = vmul.f32 0.5, %v742_v17 }
 0x17f   : > { %v2544_v36 = vpop.eup %2543  ;;  %v3394_v59 = vadd.f32 1.0, %v2542_v28  ;;  %1907 = vmatmul.mubr.f32.vlgmr.msra.gmra.mrb[64].mxu0 %v1420_v10  ;;  %v495_v3 = vadd.f32 %v494_v2, %v3306_v44  ;;  %2563 = verf.f32 %v1053_v41  ;;  %v3410_v55 = vmul.f32 0.5, %v489_v20 }
 0x180   : > { %v3373_v21 = vpop.f32.mrb[14].mxu0  ;;  %v2546_v43 = vpop.eup %2545  ;;  %v3403_v1 = vadd.f32 1.0, %v2544_v36  ;;  %v1056_v39 = vmul.f32 0.70710677, %v746_v42  ;;  %1686 = vmatprep.mubr.f32.mxu1 %v1423_v40  ;;  %2565 = verf.f32 %v1054_v50  ;;  %v1055_v14 = vmul.f32 0.70710677, %v491_v52 }
 0x181   : > { %v3376_v26 = vpop.f32.mrb[14].mxu1  ;;  %v3378_v27 = vpop.f32.mrb[15].mxu0  ;;  %v1299_v6 = vadd.f32 1.0, %v2546_v43  ;;  %v1425_v15 = vmul.f32 %v1297_v31, %v3340_v45  ;;  %v1057_v19 = vmul.f32 0.70710677, %v748_v0  ;;  %v752_v2 = vadd.f32 %v3358_v7, %v3308_v46 }
 0x182   : > { %v3382_v34 = vpop.f32.mrb[15].mxu1  ;;  %v2548_v56 = vpop.eup %2547  ;;  %v1422_v23 = vmul.f32 %v1294_v22, %v3332_v35  ;;  %v1424_v20 = vmul.f32 %v1296_v29, %v3335_v38  ;;  %v3425_v36 = vmul.f32 0.5, %v746_v42  ;;  %v1058_v45 = vmul.f32 0.70710677, %v495_v3 }
 0x183   : > { %v2550_v5 = vpop.eup %2549  ;;  %v1301_v12 = vadd.f32 1.0, %v2548_v56  ;;  %v497_v31 = vadd.f32 %v3360_v8, %v3310_v48  ;;  %1911 = vmatprep.mubr.f32.mxu0 %v1425_v15  ;;  %2567 = verf.f32 %v1056_v39  ;;  %v3431_v35 = vmul.f32 0.5, %v491_v52 }
 0x184   : > { %v3392_v54 = vpop.f32.mrb[16].mxu0  ;;  %v2552_v9 = vpop.eup %2551  ;;  %v3423_v33 = vadd.f32 1.0, %v2550_v5  ;;  %v3433_v38 = vmul.f32 0.5, %v748_v0  ;;  %v754_v7 = vadd.f32 %v3365_v13, %v3313_v51  ;;  %1687 = vmatmul.mubr.f32.gmra.mrb[66].mxu1 %v1422_v23  ;;  %1912 = vmatmul.mubr.f32.gmra.mrb[66].mxu0 %v1424_v20  ;;  %2569 = verf.f32 %v1055_v14 }
 0x185   : > { %v3399_v60 = vpop.f32.mrb[16].mxu1  ;;  %v3401_v63 = vpop.f32.mrb[17].mxu0  ;;  %v3437_v22 = vadd.f32 1.0, %v2552_v9  ;;  %v3441_v8 = vadd.f32 %v3373_v21, %v3306_v44  ;;  %2571 = verf.f32 %v1057_v19  ;;  %v3445_v43 = vmul.f32 0.5, %v495_v3 }
 0x186   : > { %v3408_v4 = vpop.f32.mrb[17].mxu1  ;;  %v2554_v10 = vpop.eup %2553  ;;  %v1060_v50 = vmul.f32 0.70710677, %v752_v2  ;;  %2573 = verf.f32 %v1058_v45  ;;  %v1059_v13 = vmul.f32 0.70710677, %v497_v31  ;;  %v758_v56 = vadd.f32 %v3376_v26, %v3308_v46 }
 0x187   : > { %v2556_v28 = vpop.eup %2555  ;;  %v1303_v29 = vadd.f32 1.0, %v2554_v10  ;;  %v1427_v0 = vmul.f32 %v1299_v6, %v3350_v58  ;;  %v1061_v39 = vmul.f32 0.70710677, %v754_v7  ;;  %v3456_v9 = vadd.f32 %v3378_v27, %v3310_v48 }
 0x188   : > { %v3413_v17 = vpop.f32.mrb[18].mxu0  ;;  %v1305_v30 = vadd.f32 1.0, %v2556_v28  ;;  %v2558_v52 = vpop.eup %2557  ;;  %v1429_v3 = vmul.f32 %v1301_v12, %v3352_v61  ;;  %v1426_v14 = vmul.f32 %v3394_v59, %v3344_v53  ;;  %v3463_v10 = vmul.f32 0.5, %v752_v2 }
 0x189   : > { %v3419_v24 = vpop.f32.mrb[18].mxu1  ;;  %v3421_v25 = vpop.f32.mrb[19].mxu0  ;;  %v1062_v58 = vmul.f32 0.70710677, %v3441_v8  ;;  %v760_v6 = vadd.f32 %v3382_v34, %v3313_v51  ;;  %1691 = vmatprep.mubr.f32.mxu1 %v1427_v0  ;;  %v1428_v27 = vmul.f32 %v3403_v1, %v3348_v57  ;;  %2575 = verf.f32 %v1060_v50 }
 0x18a   : > { %v3429_v41 = vpop.f32.mrb[19].mxu1  ;;  %v2560_v21 = vpop.eup %2559  ;;  %v3472_v12 = vmul.f32 0.5, %v497_v31  ;;  %v3474_v53 = vmul.f32 0.5, %v754_v7  ;;  %1916 = vmatprep.mubr.f32.mxu0 %v1429_v3  ;;  %1692 = vmatmul.mubr.f32.gmra.mrb[68].mxu1 %v1426_v14  ;;  %v507_v59 = vadd.f32 %v3392_v54, %v3306_v44  ;;  %2577 = verf.f32 %v1059_v13 }
 0x18b   : > { %v2562_v26 = vpop.eup %2561  ;;  %v1064_v57 = vmul.f32 0.70710677, %v758_v56  ;;  %1917 = vmatmul.mubr.f32.gmra.mrb[68].mxu0 %v1428_v27  ;;  %v1431_v1 = vmul.f32 %v1303_v29, %v3367_v16  ;;  %v1433_v20 = vmul.f32 %v1305_v30, %v3370_v18  ;;  %v1306_v45 = vadd.f32 1.0, %v2558_v52 }
 0x18c   : > { %v3443_v42 = vpop.f32.mrb[20].mxu0  ;;  %v2564_v61 = vpop.eup %2563  ;;  %v1307_v31 = vadd.f32 1.0, %v2562_v26  ;;  %2579 = verf.f32 %v1061_v39  ;;  %v1063_v7 = vmul.f32 0.70710677, %v3456_v9  ;;  %v1065_v50 = vmul.f32 0.70710677, %v760_v6 }
 0x18d   : > { %v3450_v40 = vpop.f32.mrb[20].mxu1  ;;  %v3452_v5 = vpop.f32.mrb[21].mxu0  ;;  %v1309_v54 = vadd.f32 1.0, %v2564_v61  ;;  %2581 = verf.f32 %v1062_v58  ;;  %v764_v0 = vadd.f32 %v3399_v60, %v3308_v46  ;;  %1696 = vmatprep.mubr.f32.mxu1 %v1431_v1  ;;  %1921 = vmatprep.mubr.f32.mxu0 %v1433_v20  ;;  %v1308_v29 = vadd.f32 1.0, %v2560_v21 }
 0x18e   : > { %v3461_v15 = vpop.f32.mrb[21].mxu1  ;;  %v2566_v23 = vpop.eup %2565  ;;  %v1066_v18 = vmul.f32 0.70710677, %v507_v59  ;;  %v509_v30 = vadd.f32 %v3401_v63, %v3310_v48  ;;  %v1430_v52 = vmul.f32 %v3423_v33, %v3354_v62  ;;  %2583 = verf.f32 %v1064_v57 }
 0x18f   : > { %v2568_v16 = vpop.eup %2567  ;;  %v3499_v26 = vadd.f32 1.0, %v2566_v23  ;;  %v766_v60 = vadd.f32 %v3408_v4, %v3313_v51  ;;  %v1432_v21 = vmul.f32 %v3437_v22, %v3362_v11  ;;  %v3508_v27 = vmul.f32 0.5, %v3441_v8 }
 0x190   : > { %v3470_v19 = vpop.f32.mrb[22].mxu0  ;;  %v2570_v14 = vpop.eup %2569  ;;  %v3510_v62 = vmul.f32 0.5, %v758_v56  ;;  %2585 = verf.f32 %v1063_v7  ;;  %1697 = vmatmul.mubr.f32.gmra.mrb[70].mxu1 %v1430_v52  ;;  %v513_v33 = vadd.f32 %v3413_v17, %v3306_v44  ;;  %v1068_v23 = vmul.f32 0.70710677, %v764_v0 }
 0x191   : > { %v3478_v2 = vpop.f32.mrb[22].mxu1  ;;  %v3480_v34 = vpop.f32.mrb[23].mxu0  ;;  %2587 = verf.f32 %v1065_v50  ;;  %1922 = vmatmul.mubr.f32.gmra.mrb[70].mxu0 %v1432_v21  ;;  %v1435_v4 = vmul.f32 %v1307_v31, %v3388_v47  ;;  %v1437_v11 = vmul.f32 %v1309_v54, %v3405_v49  ;;  %v3519_v8 = vmul.f32 0.5, %v3456_v9 }
 0x192   : > { %v3484_v28 = vpop.f32.mrb[23].mxu1  ;;  %v2572_v63 = vpop.eup %2571  ;;  %v3521_v56 = vmul.f32 0.5, %v760_v6  ;;  %2589 = verf.f32 %v1066_v18  ;;  %v1067_v57 = vmul.f32 0.70710677, %v509_v30  ;;  %v1311_v17 = vadd.f32 1.0, %v2570_v14 }
 0x193   : > { %v2574_v61 = vpop.eup %2573  ;;  %v1313_v20 = vadd.f32 1.0, %v2572_v63  ;;  %v1069_v7 = vmul.f32 0.70710677, %v766_v60  ;;  %v770_v50 = vadd.f32 %v3419_v24, %v3308_v46  ;;  %1701 = vmatprep.mubr.f32.mxu1 %v1435_v4  ;;  %1926 = vmatprep.mubr.f32.mxu0 %v1437_v11  ;;  %v1312_v31 = vadd.f32 1.0, %v2568_v16 }
 0x194   : > { %v3489_v13 = vpop.f32.mrb[24].mxu0  ;;  %v2576_v9 = vpop.eup %2575  ;;  %v3531_v6 = vmul.f32 0.5, %v507_v59  ;;  %v1070_v54 = vmul.f32 0.70710677, %v513_v33  ;;  %v1434_v18 = vmul.f32 %v1306_v45, %v3380_v32  ;;  %v3534_v14 = vadd.f32 1.0, %v2574_v61 }
 0x195   : > { %v3495_v39 = vpop.f32.mrb[24].mxu1  ;;  %v3497_v3 = vpop.f32.mrb[25].mxu0  ;;  %2591 = verf.f32 %v1068_v23  ;;  %v515_v24 = vadd.f32 %v3421_v25, %v3310_v48  ;;  %v1436_v21 = vmul.f32 %v1308_v29, %v3384_v37  ;;  %v3541_v11 = vmul.f32 0.5, %v764_v0 }
 0x196   : > { %v3505_v58 = vpop.f32.mrb[25].mxu1  ;;  %v2578_v52 = vpop.eup %2577  ;;  %v3543_v16 = vmul.f32 0.5, %v509_v30  ;;  %2593 = verf.f32 %v1067_v57  ;;  %v772_v32 = vadd.f32 %v3429_v41, %v3313_v51  ;;  %1702 = vmatmul.mubr.f32.gmra.mrb[72].mxu1 %v1434_v18  ;;  %v1072_v25 = vmul.f32 0.70710677, %v770_v50 }
 0x197   : > { %v2580_v4 = vpop.eup %2579  ;;  %2595 = verf.f32 %v1069_v7  ;;  %1927 = vmatmul.mubr.f32.gmra.mrb[72].mxu0 %v1436_v21  ;;  %v1439_v37 = vmul.f32 %v1311_v17, %v3431_v35  ;;  %v1441_v0 = vmul.f32 %v1313_v20, %v3433_v38  ;;  %v1316_v30 = vadd.f32 1.0, %v2576_v9 }
 0x198   : > { %v3516_v22 = vpop.f32.mrb[26].mxu0  ;;  %v2582_v61 = vpop.eup %2581  ;;  %v3555_v23 = vmul.f32 0.5, %v766_v60  ;;  %2597 = verf.f32 %v1070_v54  ;;  %v519_v41 = vadd.f32 %v3443_v42, %v3306_v44  ;;  %v1315_v18 = vadd.f32 1.0, %v2578_v52 }
 0x199   : > { %v3523_v1 = vpop.f32.mrb[26].mxu1  ;;  %v3527_v47 = vpop.f32.mrb[27].mxu0  ;;  %v1071_v7 = vmul.f32 0.70710677, %v515_v24  ;;  %1706 = vmatprep.mubr.f32.mxu1 %v1439_v37  ;;  %1931 = vmatprep.mubr.f32.mxu0 %v1441_v0  ;;  %v3563_v17 = vadd.f32 1.0, %v2582_v61  ;;  %v776_v60 = vadd.f32 %v3450_v40, %v3308_v46  ;;  %v1438_v42 = vmul.f32 %v3499_v26, %v3410_v55 }
 0x19a   : > { %v3529_v49 = vpop.f32.mrb[27].mxu1  ;;  %v2584_v57 = vpop.eup %2583  ;;  %v1073_v20 = vmul.f32 0.70710677, %v772_v32  ;;  %v3573_v52 = vmul.f32 0.5, %v770_v50  ;;  %2599 = verf.f32 %v1072_v25  ;;  %v521_v21 = vadd.f32 %v3452_v5, %v3310_v48 }
 0x19b   : > { %v2586_v38 = vpop.eup %2585  ;;  %v3580_v40 = vadd.f32 1.0, %v2584_v57  ;;  %v3582_v0 = vmul.f32 0.5, %v515_v24  ;;  %v1074_v55 = vmul.f32 0.70710677, %v519_v41  ;;  %v778_v26 = vadd.f32 %v3461_v15, %v3313_v51  ;;  %1707 = vmatmul.mubr.f32.gmra.mrb[74].mxu1 %v1438_v42 }
 0x19c   : > { %v3539_v63 = vpop.f32.mrb[28].mxu0  ;;  %2601 = verf.f32 %v1071_v7  ;;  %v3586_v50 = vmul.f32 0.5, %v772_v32  ;;  %v1443_v5 = vmul.f32 %v1315_v18, %v3472_v12  ;;  %v1319_v25 = vadd.f32 1.0, %v2586_v38 }
 0x19d   : > { %v3547_v59 = vpop.f32.mrb[28].mxu1  ;;  %v3549_v45 = vpop.f32.mrb[29].mxu0  ;;  %2603 = verf.f32 %v1073_v20  ;;  %v1076_v24 = vmul.f32 0.70710677, %v776_v60  ;;  %v3596_v15 = vmul.f32 0.5, %v519_v41  ;;  %v525_v7 = vadd.f32 %v3470_v19, %v3306_v44 }
 0x19e   : > { %4401 = vst [vmem:[#allocation12_spill] sm:$0xff] %v3547_v59  ;;  %4402 = vst [vmem:[#allocation13_spill] sm:$0xff] %v3549_v45  ;;  %v3553_v29 = vpop.f32.mrb[29].mxu1  ;;  %v1317_v45 = vadd.f32 1.0, %v2580_v4  ;;  %v3559_v59 = vmul.f32 0.5, %v513_v33  ;;  %v2588_v33 = vpop.eup %2587  ;;  %v1440_v4 = vmul.f32 %v1312_v31, %v3425_v36  ;;  %1711 = vmatprep.mubr.f32.mxu1 %v1443_v5  ;;  %2605 = verf.f32 %v1074_v55 }
 0x19f   : > { %v2590_v37 = vpop.eup %2589  ;;  %v1321_v57 = vadd.f32 1.0, %v2588_v33  ;;  %v1075_v32 = vmul.f32 0.70710677, %v521_v21  ;;  %v1077_v18 = vmul.f32 0.70710677, %v778_v26  ;;  %v782_v38 = vadd.f32 %v3478_v2, %v3308_v46 }
 0x1a0   : > { %v3561_v35 = vpop.f32.mrb[30].mxu0  ;;  %1932 = vmatmul.mubr.f32.gmra.mrb[74].mxu0 %v1440_v4  ;;  %v1445_v36 = vmul.f32 %v1317_v45, %v3474_v53  ;;  %v1442_v41 = vmul.f32 %v3534_v14, %v3445_v43  ;;  %v3608_v42 = vmul.f32 0.5, %v776_v60  ;;  %v3610_v33 = vmul.f32 0.5, %v521_v21 }
 0x1a1   : > { %v3569_v9 = vpop.f32.mrb[30].mxu1  ;;  %v3571_v54 = vpop.f32.mrb[31].mxu0  ;;  %v527_v19 = vadd.f32 %v3480_v34, %v3310_v48  ;;  %v1444_v4 = vmul.f32 %v1316_v30, %v3463_v10  ;;  %2607 = verf.f32 %v1076_v24  ;;  %v3619_v2 = vmul.f32 0.5, %v778_v26 }
 0x1a2   : > { %4403 = vst [vmem:[#allocation14_spill] sm:$0xff] %v3569_v9  ;;  %4404 = vst [vmem:[#allocation15_spill] sm:$0xff] %v3571_v54  ;;  %v3578_v61 = vpop.f32.mrb[31].mxu1  ;;  %v2592_v54 = vpop.eup %2591  ;;  %v3594_v9 = vadd.f32 1.0, %v2590_v37  ;;  %1936 = vmatprep.mubr.f32.mxu0 %v1445_v36  ;;  %v784_v43 = vadd.f32 %v3484_v28, %v3313_v51  ;;  %1712 = vmatmul.mubr.f32.gmra.mrb[76].mxu1 %v1442_v41  ;;  %2609 = verf.f32 %v1075_v32  ;;  %v1078_v34 = vmul.f32 0.70710677, %v525_v7 }
 0x1a3   : > { %4405 = vst [vmem:[#allocation16_spill] sm:$0xff] %v3578_v61  ;;  %v2594_v45 = vpop.eup %2593  ;;  %v3617_v5 = vadd.f32 1.0, %v2592_v54  ;;  %v1447_v10 = vmul.f32 %v1319_v25, %v3519_v8  ;;  %v1449_v30 = vmul.f32 %v1321_v57, %v3521_v56  ;;  %2611 = verf.f32 %v1077_v18 }
 0x1a4   : > { %v3590_v31 = vpop.f32.mrb[32].mxu0  ;;  %v2596_v20 = vpop.eup %2595  ;;  %1937 = vmatmul.mubr.f32.gmra.mrb[76].mxu0 %v1444_v4  ;;  %v1323_v21 = vadd.f32 1.0, %v2594_v45  ;;  %v1080_v26 = vmul.f32 0.70710677, %v782_v38  ;;  %v531_v28 = vadd.f32 %v3489_v13, %v3306_v44  ;;  %v1079_v32 = vmul.f32 0.70710677, %v527_v19 }
 0x1a5   : > { %v3592_v61 = vpop.f32.mrb[32].mxu1  ;;  %v3600_v12 = vpop.f32.mrb[33].mxu0  ;;  %v1325_v24 = vadd.f32 1.0, %v2596_v20  ;;  %1716 = vmatprep.mubr.f32.mxu1 %v1447_v10  ;;  %1941 = vmatprep.mubr.f32.mxu0 %v1449_v30  ;;  %v3639_v56 = vmul.f32 0.5, %v782_v38  ;;  %v1081_v25 = vmul.f32 0.70710677, %v784_v43  ;;  %v788_v57 = vadd.f32 %v3495_v39, %v3308_v46 }
 0x1a6   : > { %v3602_v53 = vpop.f32.mrb[33].mxu1  ;;  %v2598_v55 = vpop.eup %2597  ;;  %v1446_v13 = vmul.f32 %v3563_v17, %v3508_v27  ;;  %2613 = verf.f32 %v1078_v34  ;;  %v3649_v20 = vmul.f32 0.5, %v527_v19  ;;  %v533_v4 = vadd.f32 %v3497_v3, %v3310_v48 }
 0x1a7   : > { %v2600_v36 = vpop.eup %2599  ;;  %v3633_v41 = vadd.f32 1.0, %v2598_v55  ;;  %v1448_v38 = vmul.f32 %v3580_v40, %v3510_v62  ;;  %2615 = verf.f32 %v1080_v26  ;;  %v1082_v27 = vmul.f32 0.70710677, %v531_v28 }
 0x1a8   : > { %v3615_v37 = vpop.f32.mrb[34].mxu0  ;;  %v3657_v10 = vadd.f32 1.0, %v2600_v36  ;;  %v790_v17 = vadd.f32 %v3505_v58, %v3313_v51  ;;  %1717 = vmatmul.mubr.f32.gmra.mrb[78].mxu1 %v1446_v13  ;;  %2617 = verf.f32 %v1079_v32  ;;  %v537_v19 = vadd.f32 %v3516_v22, %v3306_v44 }
 0x1a9   : > { %v3623_v14 = vpop.f32.mrb[34].mxu1  ;;  %v3625_v60 = vpop.f32.mrb[35].mxu0  ;;  %1942 = vmatmul.mubr.f32.gmra.mrb[78].mxu0 %v1448_v38  ;;  %v1451_v3 = vmul.f32 %v1323_v21, %v3543_v16  ;;  %v1453_v62 = vmul.f32 %v1325_v24, %v3555_v23  ;;  %v3667_v36 = vmul.f32 0.5, %v784_v43  ;;  %2619 = verf.f32 %v1081_v25 }
 0x1aa   : > { %4406 = vst [vmem:[#allocation17_spill] sm:$0xff] %v3625_v60  ;;  %v3629_v54 = vpop.f32.mrb[35].mxu1  ;;  %v3635_v60 = vmul.f32 0.5, %v525_v7  ;;  %v2602_v7 = vpop.eup %2601  ;;  %v1084_v26 = vmul.f32 0.70710677, %v788_v57  ;;  %v3671_v32 = vmul.f32 0.5, %v531_v28  ;;  %v794_v22 = vadd.f32 %v3523_v1, %v3308_v46 }
 0x1ab   : > { %v2604_v39 = vpop.eup %2603  ;;  %v1327_v30 = vadd.f32 1.0, %v2602_v7  ;;  %v1083_v13 = vmul.f32 0.70710677, %v533_v4  ;;  %1721 = vmatprep.mubr.f32.mxu1 %v1451_v3  ;;  %1946 = vmatprep.mubr.f32.mxu0 %v1453_v62  ;;  %2621 = verf.f32 %v1082_v27  ;;  %v1085_v43 = vmul.f32 0.70710677, %v790_v17 }
 0x1ac   : > { %v3637_v8 = vpop.f32.mrb[36].mxu0  ;;  %v2606_v34 = vpop.eup %2605  ;;  %v1329_v58 = vadd.f32 1.0, %v2604_v39  ;;  %v539_v24 = vadd.f32 %v3527_v47, %v3310_v48  ;;  %v1450_v28 = vmul.f32 %v3594_v9, %v3531_v6  ;;  %v1086_v38 = vmul.f32 0.70710677, %v537_v19 }
 0x1ad   : > { %v3645_v45 = vpop.f32.mrb[36].mxu1  ;;  %v3647_v18 = vpop.f32.mrb[37].mxu0  ;;  %v3683_v7 = vadd.f32 1.0, %v2606_v34  ;;  %v3687_v1 = vadd.f32 %v3529_v49, %v3313_v51  ;;  %v1452_v39 = vmul.f32 %v3617_v5, %v3541_v11  ;;  %v3693_v62 = vmul.f32 0.5, %v788_v57 }
 0x1ae   : > { %v3655_v55 = vpop.f32.mrb[37].mxu1  ;;  %v2608_v21 = vpop.eup %2607  ;;  %2623 = verf.f32 %v1084_v26  ;;  %v3695_v47 = vmul.f32 0.5, %v533_v4  ;;  %1722 = vmatmul.mubr.f32.gmra.mrb[80].mxu1 %v1450_v28  ;;  %v543_v6 = vadd.f32 %v3539_v63, %v3306_v44  ;;  %v1088_v49 = vmul.f32 0.70710677, %v794_v22 }
 0x1af   : > { %4407 = vst [vmem:[#allocation18_spill] sm:$0xff] %v3655_v55  ;;  %v2610_v25 = vpop.eup %2609  ;;  %2625 = verf.f32 %v1083_v13  ;;  %1947 = vmatmul.mubr.f32.gmra.mrb[80].mxu0 %v1452_v39  ;;  %v1455_v11 = vmul.f32 %v1327_v30, %v3582_v0  ;;  %v1457_v5 = vmul.f32 %v1329_v58, %v3586_v50  ;;  %v1332_v26 = vadd.f32 1.0, %v2608_v21  ;;  %v4413_v58 = vld [vmem:[#allocation13_spill] sm:$0xff] }
 0x1b0   : > { %v3665_v40 = vpop.f32.mrb[38].mxu0  ;;  %v2612_v27 = vpop.eup %2611  ;;  %v1331_v4 = vadd.f32 1.0, %v2610_v25  ;;  %2627 = verf.f32 %v1085_v43  ;;  %v1087_v28 = vmul.f32 0.70710677, %v539_v24  ;;  %v1089_v63 = vmul.f32 0.70710677, %v3687_v1 }
 0x1b1   : > { %v3669_v55 = vpop.f32.mrb[38].mxu1  ;;  %v3675_v16 = vpop.f32.mrb[39].mxu0  ;;  %2629 = verf.f32 %v1086_v38  ;;  %1726 = vmatprep.mubr.f32.mxu1 %v1455_v11  ;;  %1951 = vmatprep.mubr.f32.mxu0 %v1457_v5  ;;  %v3712_v50 = vmul.f32 0.5, %v790_v17  ;;  %v1090_v30 = vmul.f32 0.70710677, %v543_v6  ;;  %v545_v21 = vadd.f32 %v4413_v58, %v3310_v48 }
 0x1b2   : > { %v3677_v23 = vpop.f32.mrb[39].mxu1  ;;  %v1454_v43 = vmul.f32 %v3633_v41, %v3559_v59  ;;  %2631 = verf.f32 %v1088_v49  ;;  %v802_v11 = vadd.f32 %v3553_v29, %v3313_v51  ;;  %v1456_v17 = vmul.f32 %v3657_v10, %v3573_v52 }
 0x1b3   : > { %4408 = vst [vmem:[#allocation19_spill] sm:$0xff] %v3677_v23  ;;  %v1333_v23 = vadd.f32 1.0, %v2612_v27  ;;  %v3732_v59 = vmul.f32 0.5, %v794_v22  ;;  %2633 = verf.f32 %v1087_v28  ;;  %v549_v41 = vadd.f32 %v3561_v35, %v3306_v44 }
 0x1b4   : > { %v3691_v3 = vpop.f32.mrb[40].mxu0  ;;  %1727 = vmatmul.mubr.f32.gmra.mrb[82].mxu1 %v1454_v43  ;;  %2635 = verf.f32 %v1089_v63  ;;  %1952 = vmatmul.mubr.f32.gmra.mrb[82].mxu0 %v1456_v17  ;;  %v1459_v29 = vmul.f32 %v1331_v4, %v3610_v33  ;;  %v1091_v22 = vmul.f32 0.70710677, %v545_v21  ;;  %v1093_v35 = vmul.f32 0.70710677, %v802_v11  ;;  %v4417_v63 = vld [vmem:[#allocation14_spill] sm:$0xff] }
 0x1b5   : > { %4409 = vst [vmem:[#allocation20_spill] sm:$0xff] %v3691_v3  ;;  %v3699_v9 = vpop.f32.mrb[40].mxu1  ;;  %v3701_v34 = vpop.f32.mrb[41].mxu0  ;;  %v1461_v49 = vmul.f32 %v1333_v23, %v3619_v2  ;;  %2637 = verf.f32 %v1090_v30  ;;  %v806_v17 = vadd.f32 %v4417_v63, %v3308_v46  ;;  %v3753_v4 = vmul.f32 0.5, %v543_v6 }
 0x1b6   : > { %4410 = vst [vmem:[#allocation21_spill] sm:$0xff] %v3701_v34  ;;  %v3705_v57 = vpop.f32.mrb[41].mxu1  ;;  %v2614_v3 = vpop.eup %2613  ;;  %v4411_v34 = vld [vmem:[#allocation12_spill] sm:$0xff]  ;;  %1731 = vmatprep.mubr.f32.mxu1 %v1459_v29  ;;  %v1458_v30 = vmul.f32 %v3683_v7, %v3596_v15  ;;  %v4420_v29 = vld [vmem:[#allocation15_spill] sm:$0xff]  ;;  %v1460_v63 = vmul.f32 %v1332_v26, %v3608_v42  ;;  %v3766_v6 = vmul.f32 0.5, %v545_v21 }
 0x1b7   : > { %v800_v13 = vadd.f32 %v4411_v34, %v3308_v46  ;;  %v2616_v0 = vpop.eup %2615  ;;  %v3722_v34 = vmul.f32 0.5, %v537_v19  ;;  %1956 = vmatprep.mubr.f32.mxu0 %v1461_v49  ;;  %v551_v49 = vadd.f32 %v4420_v29, %v3310_v48  ;;  %v1096_v29 = vmul.f32 0.70710677, %v806_v17 }
 0x1b8   : > { %v3710_v39 = vpop.f32.mrb[42].mxu0  ;;  %v2618_v27 = vpop.eup %2617  ;;  %1732 = vmatmul.mubr.f32.gmra.mrb[84].mxu1 %v1458_v30  ;;  %1957 = vmatmul.mubr.f32.gmra.mrb[84].mxu0 %v1460_v63 }
 0x1b9   : > { %4412 = vst [vmem:[#allocation12_spill] sm:$0xff] %v3710_v39  ;;  %v3718_v25 = vpop.f32.mrb[42].mxu1  ;;  %v3720_v38 = vpop.f32.mrb[43].mxu0  ;;  %v3730_v39 = vadd.f32 1.0, %v2614_v3  ;;  %v1092_v19 = vmul.f32 0.70710677, %v800_v13 }
 0x1ba   : > { %4414 = vst [vmem:[#allocation13_spill] sm:$0xff] %v3720_v38  ;;  %v3728_v5 = vpop.f32.mrb[43].mxu1  ;;  %v2620_v58 = vpop.eup %2619  ;;  %v3740_v3 = vmul.f32 0.5, %v539_v24  ;;  %v1335_v43 = vadd.f32 1.0, %v2618_v27  ;;  %v3751_v24 = vmul.f32 0.5, %v3687_v1  ;;  %v3764_v1 = vmul.f32 0.5, %v800_v13 }
 0x1bb   : > { %4415 = vst [vmem:[#allocation22_spill] sm:$0xff] %v3728_v5  ;;  %v2622_v10 = vpop.eup %2621  ;;  %v1336_v5 = vadd.f32 1.0, %v2616_v0  ;;  %v1337_v38 = vadd.f32 1.0, %v2620_v58  ;;  %v1094_v0 = vmul.f32 0.70710677, %v549_v41  ;;  %2639 = verf.f32 %v1092_v19 }
 0x1bc   : > { %v3738_v52 = vpop.f32.mrb[44].mxu0  ;;  %v2624_v23 = vpop.eup %2623  ;;  %v3757_v58 = vadd.f32 1.0, %v2622_v10  ;;  %2641 = verf.f32 %v1091_v22  ;;  %v1463_v42 = vmul.f32 %v1335_v43, %v3649_v20  ;;  %v3778_v22 = vmul.f32 0.5, %v802_v11 }
 0x1bd   : > { %v3742_v28 = vpop.f32.mrb[44].mxu1  ;;  %v3746_v33 = vpop.f32.mrb[45].mxu0  ;;  %2643 = verf.f32 %v1093_v35  ;;  %v1465_v26 = vmul.f32 %v1337_v38, %v3667_v36  ;;  %v1340_v21 = vadd.f32 1.0, %v2624_v23  ;;  %v1095_v35 = vmul.f32 0.70710677, %v551_v49 }
 0x1be   : > { %4416 = vst [vmem:[#allocation23_spill] sm:$0xff] %v3742_v28  ;;  %4418 = vst [vmem:[#allocation14_spill] sm:$0xff] %v3746_v33  ;;  %v3748_v2 = vpop.f32.mrb[45].mxu1  ;;  %v2626_v27 = vpop.eup %2625  ;;  %v4422_v28 = vld [vmem:[#allocation16_spill] sm:$0xff]  ;;  %2645 = verf.f32 %v1094_v0  ;;  %1736 = vmatprep.mubr.f32.mxu1 %v1463_v42  ;;  %v812_v11 = vadd.f32 %v3592_v61, %v3308_v46  ;;  %v3796_v0 = vmul.f32 0.5, %v806_v17  ;;  %v1464_v63 = vmul.f32 %v1336_v5, %v3639_v56 }
 0x1bf   : > { %4419 = vst [vmem:[#allocation24_spill] sm:$0xff] %v3748_v2  ;;  %v2628_v33 = vpop.eup %2627  ;;  %v808_v15 = vadd.f32 %v4422_v28, %v3313_v51  ;;  %v555_v28 = vadd.f32 %v3590_v31, %v3306_v44  ;;  %1961 = vmatprep.mubr.f32.mxu0 %v1465_v26  ;;  %v1462_v31 = vmul.f32 %v3730_v39, %v3635_v60  ;;  %2647 = verf.f32 %v1096_v29 }
 0x1c0   : > { %v3762_v2 = vpop.f32.mrb[46].mxu0  ;;  %v2630_v10 = vpop.eup %2629  ;;  %v3805_v26 = vmul.f32 0.5, %v551_v49  ;;  %v814_v39 = vadd.f32 %v3602_v53, %v3313_v51  ;;  %2649 = verf.f32 %v1095_v35  ;;  %1962 = vmatmul.mubr.f32.gmra.mrb[86].mxu0 %v1464_v63  ;;  %v1100_v49 = vmul.f32 0.70710677, %v812_v11 }
 0x1c1   : > { %4421 = vst [vmem:[#allocation15_spill] sm:$0xff] %v3762_v2  ;;  %v3770_v7 = vpop.f32.mrb[46].mxu1  ;;  %v3772_v19 = vpop.f32.mrb[47].mxu0  ;;  %v3782_v2 = vmul.f32 0.5, %v549_v41  ;;  %v3786_v38 = vadd.f32 1.0, %v2630_v10  ;;  %1737 = vmatmul.mubr.f32.gmra.mrb[86].mxu1 %v1462_v31  ;;  %v3809_v17 = vmul.f32 0.5, %v808_v15  ;;  %v561_v35 = vadd.f32 %v3615_v37, %v3306_v44 }
 0x1c2   : > { %4423 = vst [vmem:[#allocation16_spill] sm:$0xff] %v3770_v7  ;;  %4424 = vst [vmem:[#allocation25_spill] sm:$0xff] %v3772_v19  ;;  %v3776_v13 = vpop.f32.mrb[47].mxu1  ;;  %v2632_v30 = vpop.eup %2631  ;;  %v1339_v7 = vadd.f32 1.0, %v2626_v27  ;;  %v1341_v19 = vadd.f32 1.0, %v2628_v33  ;;  %v557_v27 = vadd.f32 %v3600_v12, %v3310_v48  ;;  %v3819_v53 = vmul.f32 0.5, %v555_v28 }
 0x1c3   : > { %v2634_v36 = vpop.eup %2633  ;;  %v1097_v43 = vmul.f32 0.70710677, %v808_v15  ;;  %v3803_v61 = vadd.f32 1.0, %v2632_v30  ;;  %v1098_v60 = vmul.f32 0.70710677, %v555_v28  ;;  %v1466_v28 = vmul.f32 %v3757_v58, %v3671_v32  ;;  %v4428_v37 = vld [vmem:[#allocation17_spill] sm:$0xff] }
 0x1c4   : > { %v3784_v20 = vpop.f32.mrb[48].mxu0  ;;  %v2636_v41 = vpop.eup %2635  ;;  %v1467_v12 = vmul.f32 %v1339_v7, %v3695_v47  ;;  %v1469_v56 = vmul.f32 %v1341_v19, %v3712_v50  ;;  %v1343_v29 = vadd.f32 1.0, %v2634_v36  ;;  %v1099_v15 = vmul.f32 0.70710677, %v557_v27 }
 0x1c5   : > { %v3792_v23 = vpop.f32.mrb[48].mxu1  ;;  %v3794_v33 = vpop.f32.mrb[49].mxu0  ;;  %v1345_v30 = vadd.f32 1.0, %v2636_v41  ;;  %2651 = verf.f32 %v1097_v43  ;;  %v1101_v19 = vmul.f32 0.70710677, %v814_v39  ;;  %v818_v36 = vadd.f32 %v3623_v14, %v3308_v46 }
 0x1c6   : > { %4425 = vst [vmem:[#allocation26_spill] sm:$0xff] %v3792_v23  ;;  %4426 = vst [vmem:[#allocation27_spill] sm:$0xff] %v3794_v33  ;;  %v3801_v10 = vpop.f32.mrb[49].mxu1  ;;  %v2638_v42 = vpop.eup %2637  ;;  %1741 = vmatprep.mubr.f32.mxu1 %v1467_v12  ;;  %1966 = vmatprep.mubr.f32.mxu0 %v1469_v56  ;;  %2653 = verf.f32 %v1098_v60  ;;  %v3831_v31 = vmul.f32 0.5, %v812_v11  ;;  %v3833_v41 = vmul.f32 0.5, %v557_v27  ;;  %v563_v63 = vadd.f32 %v4428_v37, %v3310_v48 }
 0x1c7   : > { %4427 = vst [vmem:[#allocation28_spill] sm:$0xff] %v3801_v10  ;;  %v2640_v33 = vpop.eup %2639  ;;  %v3817_v23 = vadd.f32 1.0, %v2638_v42  ;;  %v1468_v42 = vmul.f32 %v1340_v21, %v3693_v62  ;;  %2655 = verf.f32 %v1100_v49  ;;  %v3842_v14 = vmul.f32 0.5, %v814_v39  ;;  %1742 = vmatmul.mubr.f32.gmra.mrb[88].mxu1 %v1466_v28 }
 0x1c8   : > { %v3813_v5 = vpop.f32.mrb[50].mxu0  ;;  %v2642_v7 = vpop.eup %2641  ;;  %v3840_v56 = vadd.f32 1.0, %v2640_v33  ;;  %v820_v32 = vadd.f32 %v3629_v54, %v3313_v51  ;;  %2657 = verf.f32 %v1099_v15  ;;  %v1102_v27 = vmul.f32 0.70710677, %v561_v35 }
 0x1c9   : > { %v3815_v10 = vpop.f32.mrb[50].mxu1  ;;  %v3823_v47 = vpop.f32.mrb[51].mxu0  ;;  %1967 = vmatmul.mubr.f32.gmra.mrb[88].mxu0 %v1468_v42  ;;  %v1471_v62 = vmul.f32 %v1343_v29, %v3740_v3  ;;  %v1473_v21 = vmul.f32 %v1345_v30, %v3751_v24  ;;  %v1347_v49 = vadd.f32 1.0, %v2642_v7  ;;  %2659 = verf.f32 %v1101_v19 }
 0x1ca   : > { %v3825_v50 = vpop.f32.mrb[51].mxu1  ;;  %v2644_v43 = vpop.eup %2643  ;;  %v1104_v39 = vmul.f32 0.70710677, %v818_v36  ;;  %v567_v54 = vadd.f32 %v3637_v8, %v3306_v44  ;;  %v1103_v15 = vmul.f32 0.70710677, %v563_v63  ;;  %v3862_v24 = vmul.f32 0.5, %v818_v36 }
 0x1cb   : > { %v2646_v60 = vpop.eup %2645  ;;  %v1349_v37 = vadd.f32 1.0, %v2644_v43  ;;  %1746 = vmatprep.mubr.f32.mxu1 %v1471_v62  ;;  %1971 = vmatprep.mubr.f32.mxu0 %v1473_v21  ;;  %v1105_v29 = vmul.f32 0.70710677, %v820_v32  ;;  %v824_v30 = vadd.f32 %v3645_v45, %v3308_v46  ;;  %v1470_v8 = vmul.f32 %v3786_v38, %v3722_v34  ;;  %v4433_v38 = vld [vmem:[#allocation18_spill] sm:$0xff] }
 0x1cc   : > { %v3838_v12 = vpop.f32.mrb[52].mxu0  ;;  %v2648_v28 = vpop.eup %2647  ;;  %2661 = verf.f32 %v1102_v27  ;;  %v3872_v43 = vmul.f32 0.5, %v563_v63  ;;  %v569_v42 = vadd.f32 %v3647_v18, %v3310_v48  ;;  %v1472_v36 = vmul.f32 %v3803_v61, %v3732_v59 }
 0x1cd   : > { %v3846_v58 = vpop.f32.mrb[52].mxu1  ;;  %v3848_v11 = vpop.f32.mrb[53].mxu0  ;;  %v3880_v62 = vadd.f32 1.0, %v2648_v28  ;;  %2663 = verf.f32 %v1104_v39  ;;  %v1106_v34 = vmul.f32 0.70710677, %v567_v54  ;;  %v826_v21 = vadd.f32 %v4433_v38, %v3313_v51  ;;  %1747 = vmatmul.mubr.f32.gmra.mrb[90].mxu1 %v1470_v8 }
 0x1ce   : > { %4429 = vst [vmem:[#allocation17_spill] sm:$0xff] %v3846_v58  ;;  %4430 = vst [vmem:[#allocation29_spill] sm:$0xff] %v3848_v11  ;;  %v3852_v33 = vpop.f32.mrb[53].mxu1  ;;  %v3856_v58 = vadd.f32 1.0, %v2646_v60  ;;  %v3858_v11 = vmul.f32 0.5, %v561_v35  ;;  %v2650_v35 = vpop.eup %2649  ;;  %2665 = verf.f32 %v1103_v15  ;;  %1972 = vmatmul.mubr.f32.gmra.mrb[90].mxu0 %v1472_v36  ;;  %v573_v63 = vadd.f32 %v3665_v40, %v3306_v44 }
 0x1cf   : > { %v2652_v45 = vpop.eup %2651  ;;  %v1475_v18 = vmul.f32 %v1347_v49, %v3766_v6  ;;  %v1477_v59 = vmul.f32 %v1349_v37, %v3778_v22  ;;  %v1351_v28 = vadd.f32 1.0, %v2650_v35  ;;  %2667 = verf.f32 %v1105_v29 }
 0x1d0   : > { %v3860_v3 = vpop.f32.mrb[54].mxu0  ;;  %v2654_v27 = vpop.eup %2653  ;;  %v1108_v39 = vmul.f32 0.70710677, %v824_v30  ;;  %v1353_v8 = vadd.f32 1.0, %v2652_v45  ;;  %v3894_v15 = vmul.f32 0.5, %v567_v54  ;;  %v830_v40 = vadd.f32 %v3669_v55, %v3308_v46  ;;  %v4437_v55 = vld [vmem:[#allocation19_spill] sm:$0xff] }
 0x1d1   : > { %v3868_v7 = vpop.f32.mrb[54].mxu1  ;;  %v3870_v19 = vpop.f32.mrb[55].mxu0  ;;  %v1107_v36 = vmul.f32 0.70710677, %v569_v42  ;;  %1751 = vmatprep.mubr.f32.mxu1 %v1475_v18  ;;  %1976 = vmatprep.mubr.f32.mxu0 %v1477_v59  ;;  %2669 = verf.f32 %v1106_v34  ;;  %v575_v37 = vadd.f32 %v3675_v16, %v3310_v48  ;;  %v1474_v54 = vmul.f32 %v3817_v23, %v3753_v4  ;;  %v4439_v4 = vld [vmem:[#allocation20_spill] sm:$0xff] }
 0x1d2   : > { %4431 = vst [vmem:[#allocation30_spill] sm:$0xff] %v3868_v7  ;;  %v3878_v60 = vpop.f32.mrb[55].mxu1  ;;  %v3890_v7 = vmul.f32 0.5, %v820_v32  ;;  %v2656_v49 = vpop.eup %2655  ;;  %v1109_v32 = vmul.f32 0.70710677, %v826_v21  ;;  %v3906_v35 = vadd.f32 1.0, %v2654_v27  ;;  %v3910_v38 = vadd.f32 %v4437_v55, %v3313_v51 }
 0x1d3   : > { %4432 = vst [vmem:[#allocation31_spill] sm:$0xff] %v3878_v60  ;;  %v2658_v29 = vpop.eup %2657  ;;  %v1110_v45 = vmul.f32 0.70710677, %v573_v63  ;;  %v1476_v18 = vmul.f32 %v3840_v56, %v3764_v1  ;;  %2671 = verf.f32 %v1108_v39  ;;  %v3918_v16 = vmul.f32 0.5, %v569_v42  ;;  %1752 = vmatmul.mubr.f32.gmra.mrb[92].mxu1 %v1474_v54 }
 0x1d4   : > { %v3888_v61 = vpop.f32.mrb[56].mxu0  ;;  %v2660_v34 = vpop.eup %2659  ;;  %v579_v23 = vadd.f32 %v4439_v4, %v3306_v44  ;;  %2673 = verf.f32 %v1107_v36  ;;  %v1112_v55 = vmul.f32 0.70710677, %v830_v40  ;;  %v1479_v1 = vmul.f32 %v1351_v28, %v3805_v26 }
 0x1d5   : > { %4434 = vst [vmem:[#allocation18_spill] sm:$0xff] %v3888_v61  ;;  %v3892_v60 = vpop.f32.mrb[56].mxu1  ;;  %v3898_v6 = vpop.f32.mrb[57].mxu0  ;;  %1977 = vmatmul.mubr.f32.gmra.mrb[92].mxu0 %v1476_v18  ;;  %v1481_v56 = vmul.f32 %v1353_v8, %v3809_v17  ;;  %v1356_v39 = vadd.f32 1.0, %v2656_v49  ;;  %v1355_v42 = vadd.f32 1.0, %v2658_v29  ;;  %2675 = verf.f32 %v1109_v32  ;;  %v4442_v8 = vld [vmem:[#allocation21_spill] sm:$0xff] }
 0x1d6   : > { %4435 = vst [vmem:[#allocation32_spill] sm:$0xff] %v3892_v60  ;;  %v3900_v22 = vpop.f32.mrb[57].mxu1  ;;  %v3916_v60 = vmul.f32 0.5, %v824_v30  ;;  %v1111_v54 = vmul.f32 0.70710677, %v575_v37  ;;  %2677 = verf.f32 %v1110_v45  ;;  %v836_v36 = vadd.f32 %v3699_v9, %v3308_v46  ;;  %1756 = vmatprep.mubr.f32.mxu1 %v1479_v1 }
 0x1d7   : > { %4436 = vst [vmem:[#allocation33_spill] sm:$0xff] %v3900_v22  ;;  %v1357_v22 = vadd.f32 1.0, %v2660_v34  ;;  %v1113_v4 = vmul.f32 0.70710677, %v3910_v38  ;;  %1981 = vmatprep.mubr.f32.mxu0 %v1481_v56  ;;  %v3935_v17 = vmul.f32 0.5, %v826_v21  ;;  %v581_v49 = vadd.f32 %v4442_v8, %v3310_v48 }
 0x1d8   : > { %v3914_v59 = vpop.f32.mrb[58].mxu0  ;;  %v1114_v28 = vmul.f32 0.70710677, %v579_v23  ;;  %v1478_v32 = vmul.f32 %v3856_v58, %v3782_v2  ;;  %v3945_v9 = vmul.f32 0.5, %v573_v63  ;;  %2679 = verf.f32 %v1112_v55  ;;  %v4445_v2 = vld [vmem:[#allocation12_spill] sm:$0xff] }
 0x1d9   : > { %4438 = vst [vmem:[#allocation19_spill] sm:$0xff] %v3914_v59  ;;  %v3922_v27 = vpop.f32.mrb[58].mxu1  ;;  %v3924_v61 = vpop.f32.mrb[59].mxu0  ;;  %v838_v1 = vadd.f32 %v3705_v57, %v3313_v51  ;;  %v1480_v21 = vmul.f32 %v3880_v62, %v3796_v0  ;;  %2681 = verf.f32 %v1111_v54  ;;  %v585_v58 = vadd.f32 %v4445_v2, %v3306_v44 }
 0x1da   : > { %4440 = vst [vmem:[#allocation20_spill] sm:$0xff] %v3922_v27  ;;  %v3928_v30 = vpop.f32.mrb[59].mxu1  ;;  %v2662_v59 = vpop.eup %2661  ;;  %v3953_v27 = vmul.f32 0.5, %v830_v40  ;;  %1757 = vmatmul.mubr.f32.gmra.mrb[94].mxu1 %v1478_v32  ;;  %2683 = verf.f32 %v1113_v4  ;;  %v1116_v63 = vmul.f32 0.70710677, %v836_v36  ;;  %v1483_v55 = vmul.f32 %v1355_v42, %v3833_v41 }
 0x1db   : > { %v2664_v26 = vpop.eup %2663  ;;  %1982 = vmatmul.mubr.f32.gmra.mrb[94].mxu0 %v1480_v21  ;;  %v1485_v57 = vmul.f32 %v1357_v22, %v3842_v14  ;;  %2685 = verf.f32 %v1114_v28  ;;  %v1115_v40 = vmul.f32 0.70710677, %v581_v49  ;;  %v1117_v2 = vmul.f32 0.70710677, %v838_v1 }
 0x1dc   : > { %v3933_v18 = vpop.f32.mrb[60].mxu0  ;;  %v2666_v34 = vpop.eup %2665  ;;  %v1360_v62 = vadd.f32 1.0, %v2664_v26  ;;  %v842_v4 = vadd.f32 %v3718_v25, %v3308_v46  ;;  %1761 = vmatprep.mubr.f32.mxu1 %v1483_v55  ;;  %v3974_v42 = vmul.f32 0.5, %v579_v23  ;;  %v1118_v26 = vmul.f32 0.70710677, %v585_v58  ;;  %v4449_v25 = vld [vmem:[#allocation13_spill] sm:$0xff] }
 0x1dd   : > { %4441 = vst [vmem:[#allocation34_spill] sm:$0xff] %v3933_v18  ;;  %v3941_v29 = vpop.f32.mrb[60].mxu1  ;;  %v3943_v45 = vpop.f32.mrb[61].mxu0  ;;  %v1358_v18 = vadd.f32 1.0, %v2662_v59  ;;  %v1359_v54 = vadd.f32 1.0, %v2666_v34  ;;  %1986 = vmatprep.mubr.f32.mxu0 %v1485_v57  ;;  %v1482_v28 = vmul.f32 %v3906_v35, %v3819_v53  ;;  %2687 = verf.f32 %v1116_v63  ;;  %v4450_v23 = vld [vmem:[#allocation22_spill] sm:$0xff] }
 0x1de   : > { %4443 = vst [vmem:[#allocation21_spill] sm:$0xff] %v3941_v29  ;;  %v3951_v56 = vpop.f32.mrb[61].mxu1  ;;  %v2668_v8 = vpop.eup %2667  ;;  %v1484_v55 = vmul.f32 %v1356_v39, %v3831_v31  ;;  %2689 = verf.f32 %v1115_v40  ;;  %v1120_v35 = vmul.f32 0.70710677, %v842_v4  ;;  %v3991_v31 = vmul.f32 0.5, %v838_v1 }
 0x1df   : > { %4444 = vst [vmem:[#allocation35_spill] sm:$0xff] %v3951_v56  ;;  %v2670_v0 = vpop.eup %2669  ;;  %v3961_v56 = vmul.f32 0.5, %v575_v37  ;;  %v1361_v32 = vadd.f32 1.0, %v2668_v8  ;;  %v3972_v37 = vmul.f32 0.5, %v3910_v38  ;;  %v587_v8 = vadd.f32 %v4449_v25, %v3310_v48  ;;  %1762 = vmatmul.mubr.f32.gmra.mrb[96].mxu1 %v1482_v28  ;;  %v4451_v28 = vld [vmem:[#allocation23_spill] sm:$0xff] }
 0x1e0   : > { %v3959_v29 = vpop.f32.mrb[62].mxu0  ;;  %v2672_v22 = vpop.eup %2671  ;;  %v3978_v21 = vadd.f32 1.0, %v2670_v0  ;;  %v3985_v38 = vmul.f32 0.5, %v581_v49  ;;  %2691 = verf.f32 %v1117_v2  ;;  %1987 = vmatmul.mubr.f32.gmra.mrb[96].mxu0 %v1484_v55  ;;  %v1487_v63 = vmul.f32 %v1359_v54, %v3872_v43 }
 0x1e1   : > { %v3963_v59 = vpop.f32.mrb[62].mxu1  ;;  %v3967_v41 = vpop.f32.mrb[63].mxu0  ;;  %v1489_v0 = vmul.f32 %v1361_v32, %v3890_v7  ;;  %v1364_v25 = vadd.f32 1.0, %v2672_v22  ;;  %2693 = verf.f32 %v1118_v26  ;;  %v591_v39 = vadd.f32 %v3738_v52, %v3306_v44  ;;  %v4452_v52 = vld [vmem:[#allocation14_spill] sm:$0xff] }
 0x1e2   : > { %4446 = vst [vmem:[#allocation12_spill] sm:$0xff] %v3963_v59  ;;  %4447 = vst [vmem:[#allocation36_spill] sm:$0xff] %v3967_v41  ;;  %v3969_v14 = vpop.f32.mrb[63].mxu1  ;;  %v2674_v34 = vpop.eup %2673  ;;  %v844_v41 = vadd.f32 %v4450_v23, %v3313_v51  ;;  %v1119_v23 = vmul.f32 0.70710677, %v587_v8  ;;  %v848_v2 = vadd.f32 %v4451_v28, %v3308_v46  ;;  %1766 = vmatprep.mubr.f32.mxu1 %v1487_v63  ;;  %v3999_v7 = vmul.f32 0.5, %v585_v58 }
 0x1e3   : > { %4448 = vst [vmem:[#allocation37_spill] sm:$0xff] %v3969_v14  ;;  %v2676_v57 = vpop.eup %2675  ;;  %v3983_v14 = vmul.f32 0.5, %v836_v36  ;;  %v1363_v49 = vadd.f32 1.0, %v2674_v34  ;;  %1991 = vmatprep.mubr.f32.mxu0 %v1489_v0  ;;  %v1486_v54 = vmul.f32 %v1358_v18, %v3858_v11  ;;  %v4002_v22 = vmul.f32 0.5, %v842_v4  ;;  %v4453_v58 = vld [vmem:[#allocation24_spill] sm:$0xff] }
 0x1e4   : > { %v2678_v53 = vpop.eup %2677  ;;  %v1365_v40 = vadd.f32 1.0, %v2676_v57  ;;  %v1121_v1 = vmul.f32 0.70710677, %v844_v41  ;;  %2695 = verf.f32 %v1120_v35  ;;  %v593_v26 = vadd.f32 %v4452_v52, %v3310_v48 }
 0x1e5   : > { %v2680_v36 = vpop.eup %2679  ;;  %v3997_v43 = vadd.f32 1.0, %v2678_v53  ;;  %v1488_v34 = vmul.f32 %v1360_v62, %v3862_v24  ;;  %v4007_v0 = vmul.f32 0.5, %v587_v8  ;;  %v1122_v53 = vmul.f32 0.70710677, %v591_v39  ;;  %1767 = vmatmul.mubr.f32.gmra.mrb[98].mxu1 %v1486_v54  ;;  %v4454_v24 = vld [vmem:[#allocation15_spill] sm:$0xff] }
 0x1e6   : > { %v2682_v55 = vpop.eup %2681  ;;  %v1368_v63 = vadd.f32 1.0, %v2680_v36  ;;  %v850_v28 = vadd.f32 %v4453_v58, %v3313_v51  ;;  %2697 = verf.f32 %v1119_v23  ;;  %v1124_v11 = vmul.f32 0.70710677, %v848_v2 }
 0x1e7   : > { %v2684_v32 = vpop.eup %2683  ;;  %1992 = vmatmul.mubr.f32.gmra.mrb[98].mxu0 %v1488_v34  ;;  %v1491_v18 = vmul.f32 %v1363_v49, %v3918_v16  ;;  %v1493_v4 = vmul.f32 %v1365_v40, %v3935_v17  ;;  %v1367_v35 = vadd.f32 1.0, %v2682_v55  ;;  %v4013_v52 = vmul.f32 0.5, %v844_v41  ;;  %v4455_v17 = vld [vmem:[#allocation16_spill] sm:$0xff] }
 0x1e8   : > { %v2686_v57 = vpop.eup %2685  ;;  %2699 = verf.f32 %v1121_v1  ;;  %v597_v62 = vadd.f32 %v4454_v24, %v3306_v44  ;;  %v1369_v36 = vadd.f32 1.0, %v2684_v32  ;;  %v4019_v58 = vmul.f32 0.5, %v591_v39  ;;  %v4456_v1 = vld [vmem:[#allocation25_spill] sm:$0xff] }
 0x1e9   : > { %v2688_v8 = vpop.eup %2687  ;;  %v4017_v59 = vadd.f32 1.0, %v2686_v57  ;;  %v1123_v23 = vmul.f32 0.70710677, %v593_v26  ;;  %1771 = vmatprep.mubr.f32.mxu1 %v1491_v18  ;;  %1996 = vmatprep.mubr.f32.mxu0 %v1493_v4  ;;  %2701 = verf.f32 %v1122_v53  ;;  %v1125_v16 = vmul.f32 0.70710677, %v850_v28 }
 0x1ea   : > { %v2690_v54 = vpop.eup %2689  ;;  %v854_v41 = vadd.f32 %v4455_v17, %v3308_v46  ;;  %v1490_v49 = vmul.f32 %v3978_v21, %v3894_v15  ;;  %v4025_v55 = vmul.f32 0.5, %v848_v2  ;;  %2703 = verf.f32 %v1124_v11 }
 0x1eb   : > { %v2692_v40 = vpop.eup %2691  ;;  %v599_v39 = vadd.f32 %v4456_v1, %v3310_v48  ;;  %v1492_v32 = vmul.f32 %v1364_v25, %v3916_v60  ;;  %v1372_v57 = vadd.f32 1.0, %v2688_v8  ;;  %v4030_v18 = vmul.f32 0.5, %v593_v26 }
 0x1ec   : > { %v2694_v34 = vpop.eup %2693  ;;  %v1126_v53 = vmul.f32 0.70710677, %v597_v62  ;;  %v856_v4 = vadd.f32 %v3776_v13, %v3313_v51  ;;  %1772 = vmatmul.mubr.f32.gmra.mrb[100].mxu1 %v1490_v49  ;;  %2705 = verf.f32 %v1123_v23  ;;  %v4034_v15 = vmul.f32 0.5, %v850_v28 }
 0x1ed   : > { %1997 = vmatmul.mubr.f32.gmra.mrb[100].mxu0 %v1492_v32  ;;  %v1495_v21 = vmul.f32 %v1367_v35, %v3961_v56  ;;  %v1497_v2 = vmul.f32 %v1369_v36, %v3972_v37  ;;  %v1371_v11 = vadd.f32 1.0, %v2690_v54  ;;  %2707 = verf.f32 %v1125_v16  ;;  %v4457_v56 = vld [vmem:[#allocation26_spill] sm:$0xff]  ;;  %v4458_v16 = vld [vmem:[#allocation27_spill] sm:$0xff]  ;;  %v4459_v32 = vld [vmem:[#allocation28_spill] sm:$0xff] }
 0x1ee   : > { %v1128_v60 = vmul.f32 0.70710677, %v854_v41  ;;  %v603_v25 = vadd.f32 %v3784_v20, %v3306_v44  ;;  %v2696_v26 = vpop.eup %2695  ;;  %v1373_v24 = vadd.f32 1.0, %v2692_v40  ;;  %v4040_v8 = vadd.f32 1.0, %v2694_v34 }
 0x1ef   : > { %v4042_v13 = vmul.f32 0.5, %v597_v62  ;;  %v1127_v23 = vmul.f32 0.70710677, %v599_v39  ;;  %1776 = vmatprep.mubr.f32.mxu1 %v1495_v21  ;;  %2001 = vmatprep.mubr.f32.mxu0 %v1497_v2  ;;  %2709 = verf.f32 %v1126_v53  ;;  %v1129_v28 = vmul.f32 0.70710677, %v856_v4 }
 0x1f0   : > { %v860_v37 = vadd.f32 %v4457_v56, %v3308_v46  ;;  %v1494_v35 = vmul.f32 %v3997_v43, %v3945_v9  ;;  %v2698_v36 = vpop.eup %2697  ;;  %v4048_v54 = vmul.f32 0.5, %v854_v41  ;;  %v4050_v20 = vmul.f32 0.5, %v599_v39 }
 0x1f1   : > { %v605_v62 = vadd.f32 %v4458_v16, %v3310_v48  ;;  %v1496_v17 = vmul.f32 %v1368_v63, %v3953_v27  ;;  %v1376_v40 = vadd.f32 1.0, %v2696_v26  ;;  %2711 = verf.f32 %v1128_v60 }
 0x1f2   : > { %v2700_v49 = vpop.eup %2699  ;;  %v1130_v1 = vmul.f32 0.70710677, %v603_v25  ;;  %v862_v34 = vadd.f32 %v4459_v32, %v3313_v51  ;;  %1777 = vmatmul.mubr.f32.gmra.mrb[102].mxu1 %v1494_v35  ;;  %2713 = verf.f32 %v1127_v23  ;;  %v4057_v9 = vmul.f32 0.5, %v856_v4  ;;  %v4461_v32 = vld [vmem:[#allocation29_spill] sm:$0xff] }
 0x1f3   : > { %2002 = vmatmul.mubr.f32.gmra.mrb[102].mxu0 %v1496_v17  ;;  %v1499_v43 = vmul.f32 %v1371_v11, %v3985_v38  ;;  %v1501_v41 = vmul.f32 %v1373_v24, %v3991_v31  ;;  %v2702_v39 = vpop.eup %2701  ;;  %v1375_v53 = vadd.f32 1.0, %v2698_v36  ;;  %2715 = verf.f32 %v1129_v28 }
 0x1f4   : > { %v1132_v27 = vmul.f32 0.70710677, %v860_v37  ;;  %v609_v63 = vadd.f32 %v3813_v5, %v3306_v44  ;;  %v2704_v21 = vpop.eup %2703  ;;  %v1377_v2 = vadd.f32 1.0, %v2700_v49  ;;  %v4063_v60 = vmul.f32 0.5, %v603_v25 }
 0x1f5   : > { %v1131_v26 = vmul.f32 0.70710677, %v605_v62  ;;  %v866_v4 = vadd.f32 %v3815_v10, %v3308_v46  ;;  %1781 = vmatprep.mubr.f32.mxu1 %v1499_v43  ;;  %2006 = vmatprep.mubr.f32.mxu0 %v1501_v41  ;;  %2717 = verf.f32 %v1130_v1  ;;  %v1133_v38 = vmul.f32 0.70710677, %v862_v34 }
 0x1f6   : > { %v611_v31 = vadd.f32 %v3823_v47, %v3310_v48  ;;  %v1498_v11 = vmul.f32 %v4017_v59, %v3974_v42  ;;  %v2706_v24 = vpop.eup %2705  ;;  %v1378_v5 = vadd.f32 1.0, %v2702_v39  ;;  %v4071_v23 = vmul.f32 0.5, %v860_v37 }
 0x1f7   : > { %v4073_v25 = vmul.f32 0.5, %v605_v62  ;;  %v1500_v28 = vmul.f32 %v1372_v57, %v3983_v14  ;;  %v2708_v56 = vpop.eup %2707  ;;  %v1380_v10 = vadd.f32 1.0, %v2704_v21  ;;  %2719 = verf.f32 %v1132_v27 }
 0x1f8   : > { %v1134_v35 = vmul.f32 0.70710677, %v609_v63  ;;  %v868_v36 = vadd.f32 %v3825_v50, %v3313_v51  ;;  %1782 = vmatmul.mubr.f32.gmra.mrb[104].mxu1 %v1498_v11  ;;  %2721 = verf.f32 %v1131_v26  ;;  %v1136_v47 = vmul.f32 0.70710677, %v866_v4  ;;  %v4460_v50 = vld [vmem:[#allocation17_spill] sm:$0xff] }
 0x1f9   : > { %2007 = vmatmul.mubr.f32.gmra.mrb[104].mxu0 %v1500_v28  ;;  %v1503_v59 = vmul.f32 %v1375_v53, %v4007_v0  ;;  %v1505_v42 = vmul.f32 %v1377_v2, %v4013_v52  ;;  %v2710_v37 = vpop.eup %2709  ;;  %v4080_v16 = vmul.f32 0.5, %v862_v34  ;;  %2723 = verf.f32 %v1133_v38  ;;  %v4462_v28 = vld [vmem:[#allocation31_spill] sm:$0xff] }
 0x1fa   : > { %v1135_v14 = vmul.f32 0.70710677, %v611_v31  ;;  %v615_v57 = vadd.f32 %v3838_v12, %v3306_v44  ;;  %v1379_v62 = vadd.f32 1.0, %v2706_v24  ;;  %v1381_v17 = vadd.f32 1.0, %v2708_v56 }
 0x1fb   : > { %v4084_v49 = vmul.f32 0.5, %v609_v63  ;;  %v872_v1 = vadd.f32 %v4460_v50, %v3308_v46  ;;  %1786 = vmatprep.mubr.f32.mxu1 %v1503_v59  ;;  %2011 = vmatprep.mubr.f32.mxu0 %v1505_v42  ;;  %v2712_v0 = vpop.eup %2711  ;;  %2725 = verf.f32 %v1134_v35  ;;  %v1137_v52 = vmul.f32 0.70710677, %v868_v36 }
 0x1fc   : > { %v617_v34 = vadd.f32 %v4461_v32, %v3310_v48  ;;  %v1502_v43 = vmul.f32 %v4040_v8, %v3999_v7  ;;  %v2714_v41 = vpop.eup %2713  ;;  %v4092_v12 = vadd.f32 1.0, %v2710_v37  ;;  %v4094_v39 = vmul.f32 0.5, %v866_v4  ;;  %v4463_v37 = vld [vmem:[#allocation30_spill] sm:$0xff] }
 0x1fd   : > { %2727 = verf.f32 %v1136_v47  ;;  %v1504_v53 = vmul.f32 %v1376_v40, %v4002_v22  ;;  %v2716_v27 = vpop.eup %2715  ;;  %v4097_v63 = vmul.f32 0.5, %v611_v31  ;;  %v1138_v21 = vmul.f32 0.70710677, %v615_v57 }
 0x1fe   : > { %2729 = verf.f32 %v1135_v14  ;;  %v874_v2 = vadd.f32 %v3852_v33, %v3313_v51  ;;  %1787 = vmatmul.mubr.f32.gmra.mrb[106].mxu1 %v1502_v43  ;;  %v1140_v26 = vmul.f32 0.70710677, %v872_v1  ;;  %v4103_v7 = vadd.f32 %v3860_v3, %v3306_v44 }
 0x1ff   : > { %2012 = vmatmul.mubr.f32.gmra.mrb[106].mxu0 %v1504_v53  ;;  %v1507_v8 = vmul.f32 %v1379_v62, %v4030_v18  ;;  %v1509_v4 = vmul.f32 %v1381_v17, %v4034_v15  ;;  %v2718_v22 = vpop.eup %2717  ;;  %v1384_v40 = vadd.f32 1.0, %v2712_v0  ;;  %2731 = verf.f32 %v1137_v52  ;;  %v4464_v62 = vld [vmem:[#allocation33_spill] sm:$0xff] }
 0x200   : > { %v1139_v38 = vmul.f32 0.70710677, %v617_v34  ;;  %v4109_v31 = vadd.f32 %v3870_v19, %v3310_v48  ;;  %v1383_v33 = vadd.f32 1.0, %v2714_v41  ;;  %v1385_v11 = vadd.f32 1.0, %v2716_v27 }
 0x201   : > { %v4111_v24 = vmul.f32 0.5, %v868_v36  ;;  %v4115_v3 = vadd.f32 %v4462_v28, %v3313_v51  ;;  %1791 = vmatprep.mubr.f32.mxu1 %v1507_v8  ;;  %2016 = vmatprep.mubr.f32.mxu0 %v1509_v4  ;;  %v2720_v18 = vpop.eup %2719  ;;  %v4117_v15 = vmul.f32 0.5, %v615_v57  ;;  %2733 = verf.f32 %v1138_v21 }
 0x202   : > { %v1141_v56 = vmul.f32 0.70710677, %v874_v2  ;;  %v1506_v35 = vmul.f32 %v1378_v5, %v4019_v58  ;;  %v2722_v47 = vpop.eup %2721  ;;  %v4120_v19 = vadd.f32 1.0, %v2718_v22  ;;  %2735 = verf.f32 %v1140_v26 }
 0x203   : > { %v1142_v36 = vmul.f32 0.70710677, %v4103_v7  ;;  %v1508_v59 = vmul.f32 %v1380_v10, %v4025_v55  ;;  %v2724_v42 = vpop.eup %2723  ;;  %2737 = verf.f32 %v1139_v38  ;;  %v4126_v14 = vadd.f32 %v4463_v37, %v3308_v46  ;;  %v4466_v38 = vld [vmem:[#allocation32_spill] sm:$0xff] }
 0x204   : > { %v1143_v57 = vmul.f32 0.70710677, %v4109_v31  ;;  %1792 = vmatmul.mubr.f32.gmra.mrb[108].mxu1 %v1506_v35  ;;  %v4131_v58 = vadd.f32 %v3898_v6, %v3310_v48  ;;  %v1145_v5 = vmul.f32 0.70710677, %v4115_v3  ;;  %v4136_v17 = vadd.f32 %v4464_v62, %v3313_v51  ;;  %v4465_v6 = vld [vmem:[#allocation18_spill] sm:$0xff] }
 0x205   : > { %2017 = vmatmul.mubr.f32.gmra.mrb[108].mxu0 %v1508_v59  ;;  %v1511_v55 = vmul.f32 %v1383_v33, %v4050_v20  ;;  %v1513_v10 = vmul.f32 %v1385_v11, %v4057_v9  ;;  %v2726_v50 = vpop.eup %2725  ;;  %v4140_v0 = vmul.f32 0.5, %v872_v1  ;;  %v4142_v52 = vmul.f32 0.5, %v617_v34 }
 0x206   : > { %2739 = verf.f32 %v1141_v56  ;;  %v4146_v32 = vadd.f32 %v4465_v6, %v3306_v44  ;;  %v1388_v41 = vadd.f32 1.0, %v2720_v18  ;;  %v1387_v53 = vadd.f32 1.0, %v2722_v47 }
 0x207   : > { %v2728_v43 = vpop.eup %2727  ;;  %v1389_v27 = vadd.f32 1.0, %v2724_v42  ;;  %2741 = verf.f32 %v1142_v36  ;;  %1796 = vmatprep.mubr.f32.mxu1 %v1511_v55  ;;  %2021 = vmatprep.mubr.f32.mxu0 %v1513_v10  ;;  %v4148_v21 = vmul.f32 0.5, %v874_v2  ;;  %v1147_v9 = vmul.f32 0.70710677, %v4131_v58  ;;  %v4469_v10 = vld [vmem:[#allocation34_spill] sm:$0xff] }
 0x208   : > { %v2730_v20 = vpop.eup %2729  ;;  %2743 = verf.f32 %v1143_v57  ;;  %v1510_v1 = vmul.f32 %v4092_v12, %v4042_v13  ;;  %v1144_v34 = vmul.f32 0.70710677, %v4126_v14  ;;  %v1149_v26 = vmul.f32 0.70710677, %v4136_v17  ;;  %v4467_v12 = vld [vmem:[#allocation19_spill] sm:$0xff] }
 0x209   : > { %2745 = verf.f32 %v1145_v5  ;;  %v1512_v8 = vmul.f32 %v1384_v40, %v4048_v54  ;;  %v2732_v4 = vpop.eup %2731  ;;  %v1146_v22 = vmul.f32 0.70710677, %v4146_v32  ;;  %v4159_v2 = vadd.f32 %v4466_v38, %v3308_v46  ;;  %v4468_v40 = vld [vmem:[#allocation20_spill] sm:$0xff] }
 0x20a   : > { %1797 = vmatmul.mubr.f32.gmra.mrb[110].mxu1 %v1510_v1  ;;  %v4163_v33 = vadd.f32 %v3924_v61, %v3310_v48  ;;  %v4167_v13 = vadd.f32 %v3928_v30, %v3313_v51  ;;  %v4171_v54 = vadd.f32 %v4467_v12, %v3306_v44  ;;  %v4175_v11 = vadd.f32 %v4468_v40, %v3308_v46  ;;  %v4472_v40 = vld [vmem:[#allocation12_spill] sm:$0xff] }
 0x20b   : > { %2022 = vmatmul.mubr.f32.gmra.mrb[110].mxu0 %v1512_v8  ;;  %v1515_v28 = vmul.f32 %v1387_v53, %v4073_v25  ;;  %v1517_v18 = vmul.f32 %v1389_v27, %v4080_v16  ;;  %v2734_v56 = vpop.eup %2733  ;;  %v1390_v61 = vadd.f32 1.0, %v2726_v50  ;;  %v1392_v35 = vadd.f32 1.0, %v2728_v43 }
 0x20c   : > { %v4180_v47 = vmul.f32 0.5, %v4103_v7  ;;  %2747 = verf.f32 %v1147_v9  ;;  %v2736_v30 = vpop.eup %2735  ;;  %v1391_v36 = vadd.f32 1.0, %v2730_v20  ;;  %v1393_v59 = vadd.f32 1.0, %v2732_v4 }
 0x20d   : > { %2749 = verf.f32 %v1149_v26  ;;  %v1151_v42 = vmul.f32 0.70710677, %v4163_v33  ;;  %1801 = vmatprep.mubr.f32.mxu1 %v1515_v28  ;;  %2026 = vmatprep.mubr.f32.mxu0 %v1517_v18  ;;  %v2738_v37 = vpop.eup %2737  ;;  %v1148_v25 = vmul.f32 0.70710677, %v4159_v2  ;;  %v1153_v16 = vmul.f32 0.70710677, %v4167_v13 }
 0x20e   : > { %2751 = verf.f32 %v1144_v34  ;;  %v1514_v57 = vmul.f32 %v4120_v19, %v4063_v60  ;;  %v1150_v7 = vmul.f32 0.70710677, %v4171_v54  ;;  %v1152_v5 = vmul.f32 0.70710677, %v4175_v11  ;;  %v4470_v60 = vld [vmem:[#allocation35_spill] sm:$0xff]  ;;  %v4473_v18 = vld [vmem:[#allocation36_spill] sm:$0xff] }
 0x20f   : > { %2753 = verf.f32 %v1146_v22  ;;  %v1516_v62 = vmul.f32 %v1388_v41, %v4071_v23  ;;  %v4192_v50 = vadd.f32 %v4469_v10, %v3306_v44  ;;  %v4196_v6 = vadd.f32 %v3943_v45, %v3310_v48  ;;  %v4471_v23 = vld [vmem:[#allocation21_spill] sm:$0xff] }
 0x210   : > { %v2740_v55 = vpop.eup %2739  ;;  %2755 = verf.f32 %v1151_v42  ;;  %1802 = vmatmul.mubr.f32.gmra.mrb[112].mxu1 %v1514_v57  ;;  %v4200_v19 = vadd.f32 %v4470_v60, %v3313_v51  ;;  %v4204_v41 = vadd.f32 %v4471_v23, %v3308_v46  ;;  %v1519_v53 = vmul.f32 %v1391_v36, %v4097_v63 }
 0x211   : > { %v2742_v43 = vpop.eup %2741  ;;  %2757 = verf.f32 %v1153_v16  ;;  %2027 = vmatmul.mubr.f32.gmra.mrb[112].mxu0 %v1516_v62  ;;  %v1521_v27 = vmul.f32 %v1393_v59, %v4111_v24  ;;  %v1394_v9 = vadd.f32 1.0, %v2734_v56  ;;  %v1015_v45 = vmul.f32 0.5, %v4109_v31 }
 0x212   : > { %v2744_v20 = vpop.eup %2743  ;;  %v1017_v1 = vmul.f32 0.5, %v4115_v3  ;;  %2759 = verf.f32 %v1148_v25  ;;  %v1395_v26 = vadd.f32 1.0, %v2738_v37  ;;  %v1397_v8 = vadd.f32 1.0, %v2740_v55  ;;  %1806 = vmatprep.mubr.f32.mxu1 %v1519_v53 }
 0x213   : > { %v2746_v34 = vpop.eup %2745  ;;  %2761 = verf.f32 %v1150_v7  ;;  %v1155_v4 = vmul.f32 0.70710677, %v4196_v6  ;;  %2031 = vmatprep.mubr.f32.mxu0 %v1521_v27  ;;  %v1154_v63 = vmul.f32 0.70710677, %v4192_v50  ;;  %v1157_v24 = vmul.f32 0.70710677, %v4200_v19 }
 0x214   : > { %2763 = verf.f32 %v1152_v5  ;;  %v1518_v22 = vmul.f32 %v1390_v61, %v4084_v49  ;;  %v1156_v31 = vmul.f32 0.70710677, %v4204_v41  ;;  %v1520_v3 = vmul.f32 %v1392_v35, %v4094_v39  ;;  %v4474_v49 = vld [vmem:[#allocation37_spill] sm:$0xff] }
 0x215   : > { %2765 = verf.f32 %v1155_v4  ;;  %v4218_v38 = vadd.f32 %v3959_v29, %v3306_v44  ;;  %v4222_v28 = vadd.f32 %v4472_v40, %v3308_v46  ;;  %v4226_v56 = vadd.f32 %v4473_v18, %v3310_v48 }
 0x216   : > { %v2748_v12 = vpop.eup %2747  ;;  %2767 = verf.f32 %v1157_v24  ;;  %1807 = vmatmul.mubr.f32.gmra.mrb[114].mxu1 %v1518_v22  ;;  %v4230_v61 = vadd.f32 %v4474_v49, %v3313_v51  ;;  %v1396_v35 = vadd.f32 1.0, %v2736_v30  ;;  %v1399_v36 = vadd.f32 1.0, %v2744_v20  ;;  %2032 = vmatmul.mubr.f32.gmra.mrb[114].mxu0 %v1520_v3 }
 0x217   : > { %v2750_v39 = vpop.eup %2749  ;;  %v1523_v44 = vmul.f32 %v1395_v26, %v4142_v52  ;;  %v1525_v29 = vmul.f32 %v1397_v8, %v4148_v21  ;;  %v1398_v42 = vadd.f32 1.0, %v2742_v43  ;;  %v1401_v46 = vadd.f32 1.0, %v2746_v34 }
 0x218   : > { %v2752_v59 = vpop.eup %2751  ;;  %v1019_v37 = vmul.f32 0.5, %v4131_v58  ;;  %2769 = verf.f32 %v1154_v63  ;;  %v1403_v25 = vadd.f32 1.0, %v2748_v12  ;;  %v1158_v51 = vmul.f32 0.70710677, %v4218_v38 }
 0x219   : > { %v2754_v48 = vpop.eup %2753  ;;  %2771 = verf.f32 %v1156_v31  ;;  %v1159_v16 = vmul.f32 0.70710677, %v4226_v56  ;;  %1811 = vmatprep.mubr.f32.mxu1 %v1523_v44  ;;  %2036 = vmatprep.mubr.f32.mxu0 %v1525_v29  ;;  %v1405_v57 = vadd.f32 1.0, %v2750_v39  ;;  %v1160_v52 = vmul.f32 0.70710677, %v4222_v28 }
 0x21a   : > { %v2756_v30 = vpop.eup %2755  ;;  %v1161_v21 = vmul.f32 0.70710677, %v4230_v61  ;;  %v1522_v7 = vmul.f32 %v1394_v9, %v4117_v15  ;;  %v1400_v58 = vadd.f32 1.0, %v2752_v59  ;;  %v1524_v62 = vmul.f32 %v1396_v35, %v4140_v0 }
 0x21b   : > { %v2758_v5 = vpop.eup %2757  ;;  %2773 = verf.f32 %v1159_v16  ;;  %v1527_v55 = vmul.f32 %v1399_v36, %v1015_v45  ;;  %v1016_v60 = vmul.f32 0.5, %v4126_v14  ;;  %v1021_v43 = vmul.f32 0.5, %v4136_v17 }
 0x21c   : > { %v2760_v10 = vpop.eup %2759  ;;  %2775 = verf.f32 %v1161_v21  ;;  %1812 = vmatmul.mubr.f32.gmra.mrb[116].mxu1 %v1522_v7  ;;  %v1529_v23 = vmul.f32 %v1401_v46, %v1017_v1  ;;  %v1402_v27 = vadd.f32 1.0, %v2754_v48  ;;  %v1407_v20 = vadd.f32 1.0, %v2756_v30  ;;  %2037 = vmatmul.mubr.f32.gmra.mrb[116].mxu0 %v1524_v62  ;;  %v4261_v62 = vld [vmem:[%s4386_s4] ss:$0 sm:$0xff] }
 0x21d   : > { %v2762_v53 = vpop.eup %2761  ;;  %2777 = verf.f32 %v1158_v51  ;;  %1816 = vmatprep.mubr.f32.mxu1 %v1527_v55  ;;  %v1531_v15 = vmul.f32 %v1403_v25, %v1019_v37  ;;  %v1409_v34 = vadd.f32 1.0, %v2758_v5  ;;  %v1526_v0 = vmul.f32 %v1398_v42, %v4180_v47 }
 0x21e   : > { %v2764_v9 = vpop.eup %2763  ;;  %2779 = verf.f32 %v1160_v52  ;;  %2041 = vmatprep.mubr.f32.mxu0 %v1529_v23  ;;  %v1533_v45 = vmul.f32 %v1405_v57, %v1021_v43  ;;  %v1404_v26 = vadd.f32 1.0, %v2760_v10  ;;  %v1023_v17 = vmul.f32 0.5, %v4163_v33 }
 0x21f   : > { %v2766_v14 = vpop.eup %2765  ;;  %v1528_v8 = vmul.f32 %v1400_v58, %v1016_v60  ;;  %v1018_v4 = vmul.f32 0.5, %v4146_v32  ;;  %v1025_v63 = vmul.f32 0.5, %v4167_v13  ;;  %v1020_v24 = vmul.f32 0.5, %v4159_v2 }
 0x220   : > { %v2768_v1 = vpop.eup %2767  ;;  %1817 = vmatmul.mubr.f32.gmra.mrb[118].mxu1 %v1526_v0  ;;  %v1411_v22 = vadd.f32 1.0, %v2766_v14  ;;  %v1535_v31 = vmul.f32 %v1407_v20, %v1023_v17  ;;  %v1406_v47 = vadd.f32 1.0, %v2762_v53  ;;  %v1408_v49 = vadd.f32 1.0, %v2764_v9 }
 0x221   : > { %2042 = vmatmul.mubr.f32.gmra.mrb[118].mxu0 %v1528_v8  ;;  %1821 = vmatprep.mubr.f32.mxu1 %v1531_v15  ;;  %v1413_v12 = vadd.f32 1.0, %v2768_v1  ;;  %v1530_v40 = vmul.f32 %v1402_v27, %v1018_v4  ;;  %v1537_v18 = vmul.f32 %v1409_v34, %v1025_v63  ;;  %v1027_v39 = vmul.f32 0.5, %v4196_v6 }
 0x222   : > { %v2770_v3 = vpop.eup %2769  ;;  %2046 = vmatprep.mubr.f32.mxu0 %v1533_v45  ;;  %v1532_v32 = vmul.f32 %v1404_v26, %v1020_v24  ;;  %v1022_v13 = vmul.f32 0.5, %v4171_v54  ;;  %v1029_v35 = vmul.f32 0.5, %v4200_v19  ;;  %v1024_v36 = vmul.f32 0.5, %v4175_v11 }
 0x223   : > { %v2772_v33 = vpop.eup %2771  ;;  %v1539_v44 = vmul.f32 %v1411_v22, %v1027_v39  ;;  %v1410_v59 = vadd.f32 1.0, %v2770_v3  ;;  %v1031_v25 = vmul.f32 0.5, %v4226_v56  ;;  %v1026_v16 = vmul.f32 0.5, %v4192_v50 }
 0x224   : > { %1822 = vmatmul.mubr.f32.gmra.mrb[120].mxu1 %v1530_v40  ;;  %v1534_v46 = vmul.f32 %v1406_v47, %v1022_v13  ;;  %v1541_v37 = vmul.f32 %v1413_v12, %v1029_v35  ;;  %v1412_v6 = vadd.f32 1.0, %v2772_v33  ;;  %v1536_v51 = vmul.f32 %v1408_v49, %v1024_v36 }
 0x225   : > { %v2774_v2 = vpop.eup %2773  ;;  %2047 = vmatmul.mubr.f32.gmra.mrb[120].mxu0 %v1532_v32  ;;  %1826 = vmatprep.mubr.f32.mxu1 %v1535_v31  ;;  %v1033_v11 = vmul.f32 0.5, %v4230_v61  ;;  %v1028_v30 = vmul.f32 0.5, %v4204_v41  ;;  %v1538_v21 = vmul.f32 %v1410_v59, %v1026_v16  ;;  %v1030_v56 = vmul.f32 0.5, %v4218_v38 }
 0x226   : > { %v2776_v29 = vpop.eup %2775  ;;  %v1415_v42 = vadd.f32 1.0, %v2774_v2  ;;  %2051 = vmatprep.mubr.f32.mxu0 %v1537_v18  ;;  %v1032_v50 = vmul.f32 0.5, %v4222_v28 }
 0x227   : > { %v2778_v48 = vpop.eup %2777  ;;  %v1417_v54 = vadd.f32 1.0, %v2776_v29  ;;  %v1540_v58 = vmul.f32 %v1412_v6, %v1028_v30 }
 0x228   : > { %v2780_v19 = vpop.eup %2779  ;;  %1827 = vmatmul.mubr.f32.gmra.mrb[122].mxu1 %v1534_v46  ;;  %v1543_v57 = vmul.f32 %v1415_v42, %v1031_v25  ;;  %v1414_v52 = vadd.f32 1.0, %v2778_v48 }
 0x229   : > { %2052 = vmatmul.mubr.f32.gmra.mrb[122].mxu0 %v1536_v51  ;;  %1831 = vmatprep.mubr.f32.mxu1 %v1539_v44  ;;  %v1545_v7 = vmul.f32 %v1417_v54, %v1033_v11  ;;  %v1416_v5 = vadd.f32 1.0, %v2780_v19 }
 0x22a   : > { %2056 = vmatprep.mubr.f32.mxu0 %v1541_v37  ;;  %v1542_v61 = vmul.f32 %v1414_v52, %v1030_v56 }
 0x22b   : > { %v1544_v41 = vmul.f32 %v1416_v5, %v1032_v50 }
 0x22c   : > { %1832 = vmatmul.mubr.f32.gmra.mrb[124].mxu1 %v1538_v21 }
 0x22d   : > { %2057 = vmatmul.mubr.f32.gmra.mrb[124].mxu0 %v1540_v58  ;;  %1836 = vmatprep.mubr.f32.mxu1 %v1543_v57 }
 0x22e   : > { %2061 = vmatprep.mubr.f32.mxu0 %v1545_v7 }
 0x230   : > { %1837 = vmatmul.mubr.f32.gmra.mrb[126].mxu1 %v1542_v61 }
 0x231   : > { %2062 = vmatmul.mubr.f32.gmra.mrb[126].mxu0 %v1544_v41 }
 0x250   : > { %v1683_v55 = vpop.f32.mrb[64].mxu1 }
 0x251   : > { %v1684_v10 = vadd.f32 %v4261_v62, %v1683_v55  ;;  %v1685_v38 = vpop.f32.mrb[65].mxu1 }
 0x252   : > { %v1908_v60 = vpop.f32.mrb[64].mxu0 }
 0x253   : > { %v1909_v43 = vadd.f32 %v1908_v60, %v1684_v10  ;;  %v1910_v23 = vpop.f32.mrb[65].mxu0 }
 0x255   : > { %2067 = vst [vmem:[%s4266_s10] sm:$0xff] %v1909_v43 }
 0x257   : > { %v1688_v28 = vpop.f32.mrb[66].mxu1  ;;  %v1913_v53 = vpop.f32.mrb[66].mxu0 }
 0x258   : > { %v1689_v27 = vadd.f32 %v4261_v62, %v1688_v28  ;;  %v1690_v20 = vpop.f32.mrb[67].mxu1  ;;  %v1915_v15 = vpop.f32.mrb[67].mxu0 }
 0x25a   : > { %v1914_v9 = vadd.f32 %v1913_v53, %v1689_v27 }
 0x25c   : > { %2068 = vst [vmem:[%s4266_s10 + $0x8] sm:$0xff] %v1914_v9 }
 0x25d   : > { %v1693_v34 = vpop.f32.mrb[68].mxu1 }
 0x25e   : > { %v1694_v0 = vadd.f32 %v4261_v62, %v1693_v34  ;;  %v1918_v45 = vpop.f32.mrb[68].mxu0  ;;  %v1695_v14 = vpop.f32.mrb[69].mxu1 }
 0x25f   : > { %v1920_v26 = vpop.f32.mrb[69].mxu0 }
 0x260   : > { %v1919_v17 = vadd.f32 %v1918_v45, %v1694_v0 }
 0x262   : > { %2069 = vst [vmem:[%s4266_s10 + $0x10] sm:$0xff] %v1919_v17 }
 0x263   : > { %v1698_v8 = vpop.f32.mrb[70].mxu1 }
 0x264   : > { %v1699_v1 = vadd.f32 %v4261_v62, %v1698_v8  ;;  %v1923_v4 = vpop.f32.mrb[70].mxu0  ;;  %v1700_v63 = vpop.f32.mrb[71].mxu1 }
 0x265   : > { %v1925_v24 = vpop.f32.mrb[71].mxu0 }
 0x266   : > { %v1924_v22 = vadd.f32 %v1923_v4, %v1699_v1 }
 0x268   : > { %2070 = vst [vmem:[%s4266_s10 + $0x18] sm:$0xff] %v1924_v22 }
 0x269   : > { %v1703_v31 = vpop.f32.mrb[72].mxu1 }
 0x26a   : > { %v1704_v3 = vadd.f32 %v4261_v62, %v1703_v31  ;;  %v1928_v47 = vpop.f32.mrb[72].mxu0  ;;  %v1705_v12 = vpop.f32.mrb[73].mxu1 }
 0x26b   : > { %v1930_v40 = vpop.f32.mrb[73].mxu0 }
 0x26c   : > { %v1929_v18 = vadd.f32 %v1928_v47, %v1704_v3 }
 0x26e   : > { %2071 = vst [vmem:[%s4266_s10 + $0x20] sm:$0xff] %v1929_v18  ;;  %v1708_v33 = vpop.f32.mrb[74].mxu1 }
 0x26f   : > { %v1709_v49 = vadd.f32 %v4261_v62, %v1708_v33  ;;  %v1710_v32 = vpop.f32.mrb[75].mxu1 }
 0x273   : > { %v1933_v39 = vpop.f32.mrb[74].mxu0 }
 0x274   : > { %v1935_v13 = vpop.f32.mrb[75].mxu0  ;;  %v1934_v35 = vadd.f32 %v1933_v39, %v1709_v49 }
 0x275   : > { %v1713_v2 = vpop.f32.mrb[76].mxu1 }
 0x276   : > { %2072 = vst [vmem:[%s4266_s10 + $0x28] sm:$0xff] %v1934_v35  ;;  %v1714_v36 = vadd.f32 %v4261_v62, %v1713_v2  ;;  %v1715_v29 = vpop.f32.mrb[77].mxu1 }
 0x277   : > { %v1938_v44 = vpop.f32.mrb[76].mxu0 }
 0x278   : > { %v1940_v59 = vpop.f32.mrb[77].mxu0  ;;  %v1939_v42 = vadd.f32 %v1938_v44, %v1714_v36 }
 0x27a   : > { %2073 = vst [vmem:[%s4266_s10 + $0x30] sm:$0xff] %v1939_v42 }
 0x27b   : > { %v1718_v46 = vpop.f32.mrb[78].mxu1 }
 0x27c   : > { %v1719_v37 = vadd.f32 %v4261_v62, %v1718_v46  ;;  %v1943_v48 = vpop.f32.mrb[78].mxu0  ;;  %v1720_v6 = vpop.f32.mrb[79].mxu1 }
 0x27d   : > { %v1945_v25 = vpop.f32.mrb[79].mxu0 }
 0x27e   : > { %v1944_v54 = vadd.f32 %v1943_v48, %v1719_v37 }
 0x280   : > { %2074 = vst [vmem:[%s4266_s10 + $0x38] sm:$0xff] %v1944_v54 }
 0x281   : > { %v1723_v51 = vpop.f32.mrb[80].mxu1 }
 0x282   : > { %v1724_v19 = vadd.f32 %v4261_v62, %v1723_v51  ;;  %v1948_v16 = vpop.f32.mrb[80].mxu0  ;;  %v1725_v11 = vpop.f32.mrb[81].mxu1 }
 0x283   : > { %v1950_v30 = vpop.f32.mrb[81].mxu0 }
 0x284   : > { %v1949_v57 = vadd.f32 %v1948_v16, %v1724_v19 }
 0x286   : > { %2075 = vst [vmem:[%s4266_s10 + $0x40] sm:$0xff] %v1949_v57 }
 0x287   : > { %v1728_v52 = vpop.f32.mrb[82].mxu1  ;;  %v1953_v7 = vpop.f32.mrb[82].mxu0 }
 0x288   : > { %v1729_v21 = vadd.f32 %v4261_v62, %v1728_v52  ;;  %v1730_v5 = vpop.f32.mrb[83].mxu1  ;;  %v1955_v58 = vpop.f32.mrb[83].mxu0 }
 0x28a   : > { %v1954_v56 = vadd.f32 %v1953_v7, %v1729_v21 }
 0x28b   : > { %v1733_v50 = vpop.f32.mrb[84].mxu1  ;;  %v1958_v41 = vpop.f32.mrb[84].mxu0 }
 0x28c   : > { %2076 = vst [vmem:[%s4266_s10 + $0x48] sm:$0xff] %v1954_v56  ;;  %v1734_v61 = vadd.f32 %v4261_v62, %v1733_v50  ;;  %v1735_v55 = vpop.f32.mrb[85].mxu1  ;;  %v1960_v10 = vpop.f32.mrb[85].mxu0 }
 0x28e   : > { %v1959_v38 = vadd.f32 %v1958_v41, %v1734_v61 }
 0x290   : > { %2077 = vst [vmem:[%s4266_s10 + $0x50] sm:$0xff] %v1959_v38 }
 0x293   : > { %v1963_v23 = vpop.f32.mrb[86].mxu0 }
 0x294   : > { %v1738_v60 = vpop.f32.mrb[86].mxu1  ;;  %v1965_v53 = vpop.f32.mrb[87].mxu0 }
 0x295   : > { %v1739_v43 = vadd.f32 %v4261_v62, %v1738_v60  ;;  %v1740_v28 = vpop.f32.mrb[87].mxu1 }
 0x297   : > { %v1964_v27 = vadd.f32 %v1963_v23, %v1739_v43 }
 0x299   : > { %2078 = vst [vmem:[%s4266_s10 + $0x58] sm:$0xff] %v1964_v27 }
 0x29a   : > { %v1743_v20 = vpop.f32.mrb[88].mxu1 }
 0x29b   : > { %v1744_v15 = vadd.f32 %v4261_v62, %v1743_v20  ;;  %v1745_v34 = vpop.f32.mrb[89].mxu1 }
 0x29c   : > { %v1968_v9 = vpop.f32.mrb[88].mxu0 }
 0x29d   : > { %v1970_v0 = vpop.f32.mrb[89].mxu0  ;;  %v1969_v45 = vadd.f32 %v1968_v9, %v1744_v15 }
 0x29f   : > { %2079 = vst [vmem:[%s4266_s10 + $0x60] sm:$0xff] %v1969_v45 }
 0x2a0   : > { %v1748_v14 = vpop.f32.mrb[90].mxu1 }
 0x2a1   : > { %v1749_v26 = vadd.f32 %v4261_v62, %v1748_v14  ;;  %v1973_v17 = vpop.f32.mrb[90].mxu0  ;;  %v1750_v8 = vpop.f32.mrb[91].mxu1 }
 0x2a2   : > { %v1975_v1 = vpop.f32.mrb[91].mxu0 }
 0x2a3   : > { %v1974_v4 = vadd.f32 %v1973_v17, %v1749_v26 }
 0x2a5   : > { %2080 = vst [vmem:[%s4266_s10 + $0x68] sm:$0xff] %v1974_v4 }
 0x2a6   : > { %v1753_v63 = vpop.f32.mrb[92].mxu1 }
 0x2a7   : > { %v1754_v24 = vadd.f32 %v4261_v62, %v1753_v63  ;;  %v1755_v31 = vpop.f32.mrb[93].mxu1 }
 0x2a8   : > { %v1978_v22 = vpop.f32.mrb[92].mxu0 }
 0x2a9   : > { %v1980_v3 = vpop.f32.mrb[93].mxu0  ;;  %v1979_v47 = vadd.f32 %v1978_v22, %v1754_v24 }
 0x2ab   : > { %2081 = vst [vmem:[%s4266_s10 + $0x70] sm:$0xff] %v1979_v47 }
 0x2ad   : > { %v1758_v12 = vpop.f32.mrb[94].mxu1 }
 0x2ae   : > { %v1759_v40 = vadd.f32 %v4261_v62, %v1758_v12  ;;  %v1983_v18 = vpop.f32.mrb[94].mxu0  ;;  %v1760_v33 = vpop.f32.mrb[95].mxu1 }
 0x2af   : > { %v1985_v49 = vpop.f32.mrb[95].mxu0 }
 0x2b0   : > { %v1984_v39 = vadd.f32 %v1983_v18, %v1759_v40 }
 0x2b2   : > { %2082 = vst [vmem:[%s4266_s10 + $0x78] sm:$0xff] %v1984_v39  ;;  %v1763_v32 = vpop.f32.mrb[96].mxu1 }
 0x2b3   : > { %v1764_v13 = vadd.f32 %v4261_v62, %v1763_v32  ;;  %v1988_v35 = vpop.f32.mrb[96].mxu0  ;;  %v1765_v2 = vpop.f32.mrb[97].mxu1 }
 0x2b4   : > { %v1990_v36 = vpop.f32.mrb[97].mxu0 }
 0x2b5   : > { %v1989_v44 = vadd.f32 %v1988_v35, %v1764_v13 }
 0x2b7   : > { %2083 = vst [vmem:[%s4266_s10 + $0x80] sm:$0xff] %v1989_v44 }
 0x2b8   : > { %v1768_v29 = vpop.f32.mrb[98].mxu1 }
 0x2b9   : > { %v1769_v59 = vadd.f32 %v4261_v62, %v1768_v29  ;;  %v1770_v46 = vpop.f32.mrb[99].mxu1 }
 0x2ba   : > { %v1993_v42 = vpop.f32.mrb[98].mxu0 }
 0x2bb   : > { %v1995_v37 = vpop.f32.mrb[99].mxu0  ;;  %v1994_v48 = vadd.f32 %v1993_v42, %v1769_v59 }
 0x2bd   : > { %2084 = vst [vmem:[%s4266_s10 + $0x88] sm:$0xff] %v1994_v48 }
 0x2bf   : > { %v1773_v6 = vpop.f32.mrb[100].mxu1 }
 0x2c0   : > { %v1774_v25 = vadd.f32 %v4261_v62, %v1773_v6  ;;  %v1998_v54 = vpop.f32.mrb[100].mxu0  ;;  %v1775_v51 = vpop.f32.mrb[101].mxu1 }
 0x2c1   : > { %v2000_v19 = vpop.f32.mrb[101].mxu0 }
 0x2c2   : > { %v1999_v16 = vadd.f32 %v1998_v54, %v1774_v25 }
 0x2c4   : > { %2085 = vst [vmem:[%s4266_s10 + $0x90] sm:$0xff] %v1999_v16 }
 0x2c5   : > { %v1778_v11 = vpop.f32.mrb[102].mxu1 }
 0x2c6   : > { %v1779_v30 = vadd.f32 %v4261_v62, %v1778_v11  ;;  %v2003_v57 = vpop.f32.mrb[102].mxu0  ;;  %v1780_v52 = vpop.f32.mrb[103].mxu1 }
 0x2c7   : > { %v2005_v21 = vpop.f32.mrb[103].mxu0 }
 0x2c8   : > { %v2004_v7 = vadd.f32 %v2003_v57, %v1779_v30 }
 0x2ca   : > { %2086 = vst [vmem:[%s4266_s10 + $0x98] sm:$0xff] %v2004_v7 }
 0x2cb   : > { %v1783_v5 = vpop.f32.mrb[104].mxu1 }
 0x2cc   : > { %v1784_v58 = vadd.f32 %v4261_v62, %v1783_v5  ;;  %v2008_v56 = vpop.f32.mrb[104].mxu0  ;;  %v1785_v50 = vpop.f32.mrb[105].mxu1 }
 0x2cd   : > { %v2010_v61 = vpop.f32.mrb[105].mxu0 }
 0x2ce   : > { %v2009_v41 = vadd.f32 %v2008_v56, %v1784_v58 }
 0x2d0   : > { %2087 = vst [vmem:[%s4266_s10 + $0xa0] sm:$0xff] %v2009_v41 }
 0x2d1   : > { %v1788_v55 = vpop.f32.mrb[106].mxu1 }
 0x2d2   : > { %v1789_v10 = vadd.f32 %v4261_v62, %v1788_v55  ;;  %v2013_v38 = vpop.f32.mrb[106].mxu0  ;;  %v1790_v60 = vpop.f32.mrb[107].mxu1 }
 0x2d3   : > { %v2015_v43 = vpop.f32.mrb[107].mxu0 }
 0x2d4   : > { %v2014_v23 = vadd.f32 %v2013_v38, %v1789_v10 }
 0x2d6   : > { %2088 = vst [vmem:[%s4266_s10 + $0xa8] sm:$0xff] %v2014_v23 }
 0x2d7   : > { %v1793_v28 = vpop.f32.mrb[108].mxu1 }
 0x2d8   : > { %v1794_v53 = vadd.f32 %v4261_v62, %v1793_v28  ;;  %v2018_v27 = vpop.f32.mrb[108].mxu0  ;;  %v1795_v20 = vpop.f32.mrb[109].mxu1 }
 0x2d9   : > { %v2020_v15 = vpop.f32.mrb[109].mxu0 }
 0x2da   : > { %v2019_v9 = vadd.f32 %v2018_v27, %v1794_v53 }
 0x2dc   : > { %2089 = vst [vmem:[%s4266_s10 + $0xb0] sm:$0xff] %v2019_v9 }
 0x2dd   : > { %v1798_v34 = vpop.f32.mrb[110].mxu1 }
 0x2de   : > { %v1799_v0 = vadd.f32 %v4261_v62, %v1798_v34  ;;  %v2023_v45 = vpop.f32.mrb[110].mxu0  ;;  %v1800_v14 = vpop.f32.mrb[111].mxu1 }
 0x2df   : > { %v2025_v26 = vpop.f32.mrb[111].mxu0 }
 0x2e0   : > { %v2024_v17 = vadd.f32 %v2023_v45, %v1799_v0 }
 0x2e2   : > { %2090 = vst [vmem:[%s4266_s10 + $0xb8] sm:$0xff] %v2024_v17 }
 0x2e3   : > { %v1803_v8 = vpop.f32.mrb[112].mxu1 }
 0x2e4   : > { %v1804_v1 = vadd.f32 %v4261_v62, %v1803_v8  ;;  %v2028_v4 = vpop.f32.mrb[112].mxu0  ;;  %v1805_v63 = vpop.f32.mrb[113].mxu1 }
 0x2e5   : > { %v2030_v24 = vpop.f32.mrb[113].mxu0 }
 0x2e6   : > { %v2029_v22 = vadd.f32 %v2028_v4, %v1804_v1 }
 0x2e8   : > { %2091 = vst [vmem:[%s4266_s10 + $0xc0] sm:$0xff] %v2029_v22 }
 0x2e9   : > { %v1808_v31 = vpop.f32.mrb[114].mxu1  ;;  %v2033_v47 = vpop.f32.mrb[114].mxu0 }
 0x2ea   : > { %v1809_v3 = vadd.f32 %v4261_v62, %v1808_v31  ;;  %v1810_v12 = vpop.f32.mrb[115].mxu1  ;;  %v2035_v40 = vpop.f32.mrb[115].mxu0 }
 0x2ec   : > { %v2034_v18 = vadd.f32 %v2033_v47, %v1809_v3 }
 0x2ee   : > { %2092 = vst [vmem:[%s4266_s10 + $0xc8] sm:$0xff] %v2034_v18 }
 0x2ef   : > { %v1813_v33 = vpop.f32.mrb[116].mxu1  ;;  %v2038_v39 = vpop.f32.mrb[116].mxu0 }
 0x2f0   : > { %v1814_v49 = vadd.f32 %v4261_v62, %v1813_v33  ;;  %v1815_v32 = vpop.f32.mrb[117].mxu1  ;;  %v2040_v13 = vpop.f32.mrb[117].mxu0 }
 0x2f2   : > { %v2039_v35 = vadd.f32 %v2038_v39, %v1814_v49 }
 0x2f3   : > { %v1818_v2 = vpop.f32.mrb[118].mxu1 }
 0x2f4   : > { %2093 = vst [vmem:[%s4266_s10 + $0xd0] sm:$0xff] %v2039_v35  ;;  %v1819_v36 = vadd.f32 %v4261_v62, %v1818_v2  ;;  %v2043_v44 = vpop.f32.mrb[118].mxu0  ;;  %v1820_v29 = vpop.f32.mrb[119].mxu1 }
 0x2f5   : > { %v2045_v59 = vpop.f32.mrb[119].mxu0 }
 0x2f6   : > { %v2044_v42 = vadd.f32 %v2043_v44, %v1819_v36 }
 0x2f7   : > { %v1823_v46 = vpop.f32.mrb[120].mxu1 }
 0x2f8   : > { %2094 = vst [vmem:[%s4266_s10 + $0xd8] sm:$0xff] %v2044_v42  ;;  %v1824_v37 = vadd.f32 %v4261_v62, %v1823_v46  ;;  %v2048_v48 = vpop.f32.mrb[120].mxu0  ;;  %v1825_v6 = vpop.f32.mrb[121].mxu1 }
 0x2f9   : > { %v2050_v25 = vpop.f32.mrb[121].mxu0 }
 0x2fa   : > { %v2049_v54 = vadd.f32 %v2048_v48, %v1824_v37 }
 0x2fb   : > { %v1828_v51 = vpop.f32.mrb[122].mxu1 }
 0x2fc   : > { %2095 = vst [vmem:[%s4266_s10 + $0xe0] sm:$0xff] %v2049_v54  ;;  %v1829_v19 = vadd.f32 %v4261_v62, %v1828_v51  ;;  %v2053_v16 = vpop.f32.mrb[122].mxu0  ;;  %v1830_v11 = vpop.f32.mrb[123].mxu1 }
 0x2fd   : > { %v2055_v30 = vpop.f32.mrb[123].mxu0 }
 0x2fe   : > { %v2054_v57 = vadd.f32 %v2053_v16, %v1829_v19 }
 0x2ff   : > { %v1833_v52 = vpop.f32.mrb[124].mxu1 }
 0x300   : > { %2096 = vst [vmem:[%s4266_s10 + $0xe8] sm:$0xff] %v2054_v57  ;;  %v1834_v21 = vadd.f32 %v4261_v62, %v1833_v52  ;;  %v2058_v7 = vpop.f32.mrb[124].mxu0  ;;  %v1835_v5 = vpop.f32.mrb[125].mxu1 }
 0x301   : > { %v2060_v58 = vpop.f32.mrb[125].mxu0 }
 0x302   : > { %v2059_v56 = vadd.f32 %v2058_v7, %v1834_v21 }
 0x303   : > { %v1838_v50 = vpop.f32.mrb[126].mxu1 }
 0x304   : > { %2097 = vst [vmem:[%s4266_s10 + $0xf0] sm:$0xff] %v2059_v56  ;;  %v1839_v61 = vadd.f32 %v4261_v62, %v1838_v50  ;;  %v2063_v41 = vpop.f32.mrb[126].mxu0  ;;  %v1840_v55 = vpop.f32.mrb[127].mxu1 }
 0x305   : > { %v2065_v10 = vpop.f32.mrb[127].mxu0 }
 0x306   : > { %v2064_v38 = vadd.f32 %v2063_v41, %v1839_v61 }
 0x308   : > { %2098 = vst [vmem:[%s4266_s10 + $0xf8] sm:$0xff] %v2064_v38 }
 0x309   : > { %2880 = shalt.err (!%p2877_p2)
}
 0x30a   : > { %s2881_s14 = scalar_lea.hbm %s4335_s11, 4096  ;;  %s2885_s12 = scalar_lea.hbm %s4387_s5, 8192 }
 0x30b   : > { %p2882_p13 = scmp.ne.s32.totalorder %s4335_s11, %s2881_s14  ;;  %p2886_p4 = scmp.lt.u32.totalorder %s4335_s11, %s4387_s5 }
 0x30c   : > { %p2887_p7 = scmp.lt.u32.totalorder %s2885_s12, %s2881_s14  ;;  %p2889_p11 = scmp.lt.u32.totalorder %s2881_s14, %s4335_s11 }
 0x30d   : > { %p2883_p6 = pnand %p2882_p13, %p4475_p0 }
 0x30e   : > { %p2888_p8 = por %p2887_p7, %p2886_p4 }
 0x30f   : > { %p2884_p10 = pneg %p2883_p6 }
 0x310   : > { %p2890_p1 = por %p2889_p11, %p2888_p8 }
 0x312   : > { %p2891_p3 = pnand %p2890_p1, %p2884_p10 }
 0x314   : > { %2894 = shalt.err (!%p2891_p3)
}
 0x315   : > { %s2949_s28 = smov 128   ;;  %s2950_s9 = smov 8  }
 0x316   : > { %2460 = dma.vmem_to_hbm [thread:$0]  (%p4475_p0), %s4337_s15, 4096, %s4335_s11, %s2100_s22, %s2949_s28, %s2949_s28, %s2950_s9  }
 0x317 PF: > { %s2128_s30 = sand.u32 1, %s2925_s18   ;;  %p4476_p5 = scmp.ne.s32.totalorder %s4392_s25, 0 }
 0x318   : > { %p4477_p9 = scmp.ge.s32.totalorder %s2937_s21, 2  ;;  %s2129_s23 = scalar_lea.sflag [#allocation4], %s2128_s30 }
 0x31a   : > { %p2474_p12 = pnand %p4477_p9, %p4476_p5 }
 0x31c   : > { %2920 = dma.done.wait (!%p2474_p12), %s2129_s23, 4096  }
 0x31d   : > { %2922 = vsyncadd (!%p2474_p12), %s2129_s23, 4294963200  ;;  %p19_p2 = scmp.ge.s32.totalorder %s3094_s16, 4   ;;  %s4478_s18 = smov %s2929_s19 }
 0x31e   : > { %s4479_s19 = smov %s2933_s20  ;;  %s4480_s20 = smov %s3103_s27 }
 0x31f   : > { %s4481_s21 = smov %s3094_s16  ;;  %21 = sbr.rel (!%p19_p2) target bundleno = 6 (0x6), region = 93 }
 0x326   :  { %2134 = vsyncpa [#allocation3], 1 }
 0x327   :  { %2136 = vsyncpa [#allocation3 + $0x1], 1 }
 0x328   :  { %2137 = vsyncpa [#allocation6], 1 }
 0x329   :  { %2138 = vsyncpa [#allocation4], 1 }
 0x32a   :  { %2140 = vsyncpa [#allocation4 + $0x1], 1 }

</bundles_post_ra>
